<compile_context>
chip_gen: v7x
topology: tpu7x:2x2x1
jax: 0.10.0
libtpu: 0.0.40
codegen_flags: <defaults>
</compile_context>

<pallas_src>
import functools

import jax
import jax.numpy as jnp
from jax import lax
from jax.experimental import pallas as pl
from jax.experimental.pallas import tpu as pltpu

LEAKY_SLOPE = 0.01          # PyTorch nn.LeakyReLU default
_SUBLANE = 8                # f32 sublane quantum (channel padding)
_LANE = 128


def _round_up(v, m):
    return (v + m - 1) // m * m


# ----------------------------------------------------------------------------
# Fused kernel
# ----------------------------------------------------------------------------
def _decode_res_block_kernel(
    x_ref,        # (1, Cin_p, h*w)      low-res input, channel-padded, flat
    skip_ref,     # (1, Cout_p, Lv)      skip on the width-padded "valid grid"
    kup_ref,      # (h*w, Lv)            bilinear-upsample matrix
    mask_ref,     # (1, Lv)              1.0 on real columns, 0.0 on pad columns
    w1_ref,       # (Cout_p, 9*Ccat_p)   conv1 weights (tap-major x channel)
    b1_ref,       # (Cout_p, 1)
    w2_ref,       # (Cout_p, 9*Cout_p)   conv2 weights
    b2_ref,       # (Cout_p, 1)
    *rest,        # [wx (Cout_p,Cin_p), bx (Cout_p,1)], o_ref, buf_ref
    wp: int,      # padded row stride = W + 2
    origin: int,  # lane offset of padded pixel (0, 0) inside the scratch
    has_proj: bool,
):
    if has_proj:
        wx_ref, bx_ref, o_ref, buf_ref = rest
    else:
        o_ref, buf_ref = rest

    cin_p = x_ref.shape[1]
    cout_p = o_ref.shape[1]
    ccat_p = buf_ref.shape[0]
    lv = o_ref.shape[2]                 # H * (W + 2)
    interior = origin + wp              # 128-aligned lane offset of pixel (0,0)
    f32 = jnp.float32
    mm = w1_ref.dtype                   # matmul operand dtype (f32 or bf16)

    # (0) zero the padded scratch: halo rows/cols + guards must be 0.
    buf_ref[...] = jnp.zeros_like(buf_ref)

    # (1) bilinear upsample == one MXU matmul, straight onto the valid grid.
    up = jnp.dot(x_ref[0].astype(kup_ref.dtype), kup_ref[...],
                 preferred_element_type=f32)                 # (Cin_p, Lv) f32

    # (2) "concat([up, skip], C)" == write both into the scratch interior
    #     (lane start `interior` is a multiple of 128 by construction).
    buf_ref[0:cin_p, interior:interior + lv] = up
    buf_ref[cin_p:ccat_p, interior:interior + lv] = skip_ref[0].astype(f32)

    mask = mask_ref[...]                                     # (1, Lv)

    def conv3x3_lrelu(nchan, w_ref, b_ref):
        # im2col: the 9 taps are contiguous lane-slices of the flat padded
        # scratch; one lane-dense MXU matmul (Cout_p, 9*nchan)@(9*nchan, Lv).
        taps = [
            buf_ref[0:nchan,
                    origin - 1 + kh * wp + kw:
                    origin - 1 + kh * wp + kw + lv]
            for kh in range(3) for kw in range(3)
        ]
        patches = jnp.concatenate(taps, axis=0).astype(mm)
        acc = jnp.dot(w_ref[...], patches, preferred_element_type=f32)
        acc = acc + b_ref[...]                               # bias (f32)
        return jnp.where(acc > 0, acc, LEAKY_SLOPE * acc)    # LeakyReLU(0.01)

    h1 = conv3x3_lrelu(ccat_p, w1_ref, b1_ref)               # encode[0]
    # re-embed h1 for the second conv; the mask zeroes the junk pad columns.
    buf_ref[0:cout_p, interior:interior + lv] = h1 * mask
    h2 = conv3x3_lrelu(cout_p, w2_ref, b2_ref)               # encode[1]

    # (3) residual path reuses the VMEM-resident `up` (no HBM re-read).
    if has_proj:
        proj = jnp.dot(wx_ref[...], up.astype(mm),
                       preferred_element_type=f32) + bx_ref[...]
        res = h2 + proj
    else:
        res = h2 + up
    o_ref[0] = jnp.maximum(res, 0.0)                         # lane-dense store


# ----------------------------------------------------------------------------
# Wrapper-side constant builders (tiny, constant-folded under jit)
# ----------------------------------------------------------------------------
def _bilinear_1d_matrix(in_size, out_size):
    """PyTorch F.interpolate(bilinear, align_corners=False) as a matrix."""
    scale = in_size / out_size
    src = jnp.clip((jnp.arange(out_size, dtype=jnp.float32) + 0.5) * scale - 0.5,
                   0.0, None)
    i0 = jnp.floor(src).astype(jnp.int32)
    i1 = jnp.minimum(i0 + 1, in_size - 1)
    frac = src - i0.astype(jnp.float32)
    rows = jnp.arange(out_size)
    m = jnp.zeros((out_size, in_size), jnp.float32)
    m = m.at[rows, i0].add(1.0 - frac)
    m = m.at[rows, i1].add(frac)
    return m                                                  # (out, in)


def _upsample_matrix(h, w, H, W, wp):
    """(h*w, H*wp): flat low-res image -> flat width-padded bilinear upsample."""
    mh = _bilinear_1d_matrix(h, H)                            # (H, h)
    mw = _bilinear_1d_matrix(w, W)                            # (W, w)
    k = jnp.einsum("Ii,Jj->ijIJ", mh, mw).reshape(h * w, H, W)
    k = jnp.zeros((h * w, H, wp), jnp.float32).at[:, :, 1:W + 1].set(k)
    return k.reshape(h * w, H * wp)


# ----------------------------------------------------------------------------
# Public forward
# ----------------------------------------------------------------------------
def decode_res_block_2d(x, skip, packed):
    """x: (N, in_chl, h, w) NCHW; skip: (N, out_chl, H, W) NCHW -> NCHW out."""
    n, cin, h, w = x.shape
    n2, cout, H, W = skip.shape
    assert n == n2
    cin_p = _round_up(cin, _SUBLANE)
    cout_p = _round_up(cout, _SUBLANE)
    ccat_p = cin_p + cout_p
    has_proj = "wx" in packed
    if not has_proj:
        assert cin_p == cout_p            # module guarantees in_chl == out_chl
    assert packed["w1"].shape == (cout_p, 9 * ccat_p)
    assert packed["w2"].shape == (cout_p, 9 * cout_p)

    wp = W + 2                            # padded row stride
    lv = H * wp                           # valid grid: H rows x padded width
    origin = (-wp) % _LANE or _LANE       # makes the interior window 128-aligned
    buf_len = origin + (H + 2) * wp + 1   # covers all 9 tap windows
    mm_dtype = packed["w1"].dtype

    # tiny O(C*H*W) repacking glue: channel pad / width pad / flatten (no
    # transposes, no full-resolution concat, no 3x3 halo pad in the wrapper).
    x_p = jnp.pad(x, ((0, 0), (0, cin_p - cin), (0, 0), (0, 0)))
    x_p = x_p.reshape(n, cin_p, h * w)
    skip_p = jnp.pad(skip, ((0, 0), (0, cout_p - cout), (0, 0), (1, 1)))
    skip_p = skip_p.reshape(n, cout_p, lv)
    kup = _upsample_matrix(h, w, H, W, wp).astype(mm_dtype)
    colmask = (jnp.zeros((1, H, wp), jnp.float32)
               .at[:, :, 1:W + 1].set(1.0).reshape(1, lv))

    kernel = functools.partial(_decode_res_block_kernel,
                               wp=wp, origin=origin, has_proj=has_proj)

    in_specs = [
        pl.BlockSpec((1, cin_p, h * w), lambda i: (i, 0, 0)),
        pl.BlockSpec((1, cout_p, lv), lambda i: (i, 0, 0)),
        pl.BlockSpec((h * w, lv), lambda i: (0, 0)),
        pl.BlockSpec((1, lv), lambda i: (0, 0)),
        pl.BlockSpec((cout_p, 9 * ccat_p), lambda i: (0, 0)),
        pl.BlockSpec((cout_p, 1), lambda i: (0, 0)),
        pl.BlockSpec((cout_p, 9 * cout_p), lambda i: (0, 0)),
        pl.BlockSpec((cout_p, 1), lambda i: (0, 0)),
    ]
    args = [x_p, skip_p, kup, colmask,
            packed["w1"], packed["b1"], packed["w2"], packed["b2"]]
    if has_proj:
        in_specs += [pl.BlockSpec((cout_p, cin_p), lambda i: (0, 0)),
                     pl.BlockSpec((cout_p, 1), lambda i: (0, 0))]
        args += [packed["wx"], packed["bx"]]

    # NOTE: for production-sized H*W on v7x (64 MiB VMEM), tile the grid over
    # row blocks (with a 1-row halo via the index_map) instead of whole images.
    out = pl.pallas_call(
        kernel,
        out_shape=jax.ShapeDtypeStruct((n, cout_p, lv), jnp.float32),
        grid=(n,),
        in_specs=in_specs,
        out_specs=pl.BlockSpec((1, cout_p, lv), lambda i: (i, 0, 0)),
        scratch_shapes=[pltpu.VMEM((ccat_p, buf_len), jnp.float32)],
        compiler_params=pltpu.CompilerParams(
            dimension_semantics=("parallel",)),
    )(*args)

    # strip channel padding + the two junk pad columns per row -> NCHW output.
    return out.reshape(n, cout_p, H, wp)[:, :cout, :, 1:W + 1]


# ----------------------------------------------------------------------------
# Parameters: PyTorch-layout init + packing into the kernel layout
# ----------------------------------------------------------------------------
def init_params(key, in_chl, out_chl):
    """Synthetic parameters in PyTorch's native layouts (OIHW weights)."""
    ks = jax.random.split(key, 6)
    cat = in_chl + out_chl
    p = {
        "w1": 0.1 * jax.random.normal(ks[0], (out_chl, cat, 3, 3), jnp.float32),
        "b1": 0.1 * jax.random.normal(ks[1], (out_chl,), jnp.float32),
        "w2": 0.1 * jax.random.normal(ks[2], (out_chl, out_chl, 3, 3), jnp.float32),
        "b2": 0.1 * jax.random.normal(ks[3], (out_chl,), jnp.float32),
    }
    if in_chl != out_chl:
        p["wx"] = 0.1 * jax.random.normal(ks[4], (out_chl, in_chl, 1, 1),
                                          jnp.float32)
        p["bx"] = 0.1 * jax.random.normal(ks[5], (out_chl,), jnp.float32)
    return p


def pack_params(params, in_chl, out_chl, matmul_dtype=jnp.float32):
    """OIHW params -> kernel layout.

    3x3 weights become (Cout_p, 9*C_p) with column = (kh*3+kw)*C_p + c; the
    conv1 input channels are the [up | skip] groups, each padded to a multiple
    of 8.  Use matmul_dtype=jnp.bfloat16 on v6e/v7x for higher MXU throughput
    (accumulation / bias / activations stay f32).
    """
    cin_p = _round_up(in_chl, _SUBLANE)
    cout_p = _round_up(out_chl, _SUBLANE)

    def pack3x3(w, groups):
        parts, start = [], 0
        for real, padded in groups:
            wg = w[:, start:start + real]
            wg = jnp.pad(wg, ((0, cout_p - out_chl), (0, padded - real),
                              (0, 0), (0, 0)))
            parts.append(wg)
            start += real
        wcat = jnp.concatenate(parts, axis=1)       # (cout_p, C_p, 3, 3)
        ctot = wcat.shape[1]
        return (jnp.transpose(wcat, (0, 2, 3, 1))   # (cout_p, 3, 3, C_p)
                .reshape(cout_p, 9 * ctot).astype(matmul_dtype))

    def pack_bias(b):
        return jnp.pad(b, (0, cout_p - out_chl)).reshape(cout_p, 1)

    packed = {
        "w1": pack3x3(params["w1"], [(in_chl, cin_p), (out_chl, cout_p)]),
        "b1": pack_bias(params["b1"]),
        "w2": pack3x3(params["w2"], [(out_chl, cout_p)]),
        "b2": pack_bias(params["b2"]),
    }
    if "wx" in params:
        wx = params["wx"][:, :, 0, 0]
        packed["wx"] = jnp.pad(
            wx, ((0, cout_p - out_chl), (0, cin_p - in_chl))).astype(matmul_dtype)
        packed["bx"] = pack_bias(params["bx"])
    return packed


# ----------------------------------------------------------------------------
# Pure-JAX reference (mirror of the PyTorch forward) for correctness checking
# ----------------------------------------------------------------------------
_DN = ("NCHW", "OIHW", "NCHW")


def _reference_bilinear_upsample(x, H, W):
    n, c, h, w = x.shape
    sh, sw = h / H, w / W
    src_h = jnp.clip((jnp.arange(H, dtype=jnp.float32) + 0.5) * sh - 0.5, 0.0, None)
    src_w = jnp.clip((jnp.arange(W, dtype=jnp.float32) + 0.5) * sw - 0.5, 0.0, None)
    h0 = jnp.floor(src_h).astype(jnp.int32)
    w0 = jnp.floor(src_w).astype(jnp.int32)
    h1 = jnp.minimum(h0 + 1, h - 1)
    w1 = jnp.minimum(w0 + 1, w - 1)
    lh = (src_h - h0.astype(jnp.float32))[None, None, :, None]
    lw = (src_w - w0.astype(jnp.float32))[None, None, None, :]
    xh0, xh1 = x[:, :, h0, :], x[:, :, h1, :]
    top = xh0[:, :, :, w0] * (1 - lw) + xh0[:, :, :, w1] * lw
    bot = xh1[:, :, :, w0] * (1 - lw) + xh1[:, :, :, w1] * lw
    return top * (1 - lh) + bot * lh


def _leaky(v):
    return jnp.where(v > 0, v, LEAKY_SLOPE * v)


def reference_forward(x, skip, params):
    _, _, H, W = skip.shape
    up = _reference_bilinear_upsample(x, H, W)
    cat = jnp.concatenate([up, skip], axis=1)

    def conv(z, wname, bname, pad):
        y = lax.conv_general_dilated(
            z, params[wname], (1, 1), ((pad, pad), (pad, pad)),
            dimension_numbers=_DN, precision=lax.Precision.HIGHEST)
        return y + params[bname][None, :, None, None]

    h1 = _leaky(conv(cat, "w1", "b1", 1))
    h2 = _leaky(conv(h1, "w2", "b2", 1))
    if "wx" in params:
        res = h2 + conv(up, "wx", "bx", 0)
    else:
        res = h2 + up
    return jnp.maximum(res, 0.0)


# ----------------------------------------------------------------------------
if __name__ == "__main__":
    root = jax.random.PRNGKey(0)
    cfg_keys = jax.random.split(root, 2)

    configs = [
        # (batch, in_chl, out_chl, h, w, H, W)
        (2, 4, 8, 8, 8, 16, 16),   # in != out -> 1x1 residual projection path
        (2, 8, 8, 8, 8, 16, 16),   # in == out -> plain residual add path
    ]

    fwd = jax.jit(decode_res_block_2d)
    for cfg_key, (batch, cin, cout, h, w, H, W) in zip(cfg_keys, configs):
        kx, ks, kp = jax.random.split(cfg_key, 3)
        x = jax.random.normal(kx, (batch, cin, h, w), jnp.float32)
        skip = jax.random.normal(ks, (batch, cout, H, W), jnp.float32)
        params = init_params(kp, cin, cout)
        packed = pack_params(params, cin, cout)   # matmul_dtype=bf16 on v6e/v7x

        out = jax.block_until_ready(fwd(x, skip, packed))
        assert out.shape == (batch, cout, H, W), out.shape

        ref = reference_forward(x, skip, params)
        err = float(jnp.max(jnp.abs(out - ref)))
        assert err < 2e-2, f"mismatch vs pure-JAX reference: max|err| = {err}"

    print("KERNEL_OK")
</pallas_src>

<mosaic_0001>
module attributes {stable_mosaic.version = 11 : i64} {
  func.func private @main(%arg0: i32) attributes {dimension_semantics = [#tpu.dimension_semantics<core_parallel>], iteration_bounds = array<i64: 2>, tpu.core_type = #tpu.core_type<sc_scalar_subcore>, window_params = []} {
    return
  }
}

module attributes {stable_mosaic.version = 11 : i64} {
  func.func private @main(%arg0: i32) attributes {dimension_semantics = [#tpu.dimension_semantics<core_parallel>], iteration_bounds = array<i64: 2>, tpu.core_type = #tpu.core_type<sc_scalar_subcore>, window_params = []} {
    return
  }
}

module attributes {stable_mosaic.version = 11 : i64} {
  func.func @_decode_res_block_kernel(%arg0: i32, %arg1: memref<1x8x64xf32, #tpu.memory_space<vmem>>, %arg2: memref<1x8x288xf32, #tpu.memory_space<vmem>>, %arg3: memref<64x288xf32, #tpu.memory_space<vmem>>, %arg4: memref<1x288xf32, #tpu.memory_space<vmem>>, %arg5: memref<8x144xf32, #tpu.memory_space<vmem>>, %arg6: memref<8x1xf32, #tpu.memory_space<vmem>>, %arg7: memref<8x72xf32, #tpu.memory_space<vmem>>, %arg8: memref<8x1xf32, #tpu.memory_space<vmem>>, %arg9: memref<8x8xf32, #tpu.memory_space<vmem>>, %arg10: memref<8x1xf32, #tpu.memory_space<vmem>>, %arg11: memref<1x8x288xf32, #tpu.memory_space<vmem>>, %arg12: memref<16x435xf32, #tpu.memory_space<vmem>>) attributes {dimension_semantics = [#tpu.dimension_semantics<parallel>], iteration_bounds = array<i64: 2>, scalar_prefetch = 0 : i64, scratch_operands = 1 : i64, tpu.core_type = #tpu.core_type<tc>, window_params = [{transform_indices = @transform_0, window_bounds = array<i64: 1, 8, 64>}, {transform_indices = @transform_1, window_bounds = array<i64: 1, 8, 288>}, {pipeline_mode = #tpu.pipeline_mode<synchronous>, transform_indices = @transform_2, window_bounds = array<i64: 64, 288>}, {pipeline_mode = #tpu.pipeline_mode<synchronous>, transform_indices = @transform_3, window_bounds = array<i64: 1, 288>}, {pipeline_mode = #tpu.pipeline_mode<synchronous>, transform_indices = @transform_4, window_bounds = array<i64: 8, 144>}, {pipeline_mode = #tpu.pipeline_mode<synchronous>, transform_indices = @transform_5, window_bounds = array<i64: 8, 1>}, {pipeline_mode = #tpu.pipeline_mode<synchronous>, transform_indices = @transform_6, window_bounds = array<i64: 8, 72>}, {pipeline_mode = #tpu.pipeline_mode<synchronous>, transform_indices = @transform_7, window_bounds = array<i64: 8, 1>}, {pipeline_mode = #tpu.pipeline_mode<synchronous>, transform_indices = @transform_8, window_bounds = array<i64: 8, 8>}, {pipeline_mode = #tpu.pipeline_mode<synchronous>, transform_indices = @transform_9, window_bounds = array<i64: 8, 1>}, {transform_indices = @transform_10, window_bounds = array<i64: 1, 8, 288>}]} {
    %cst = arith.constant 0.000000e+00 : f32
    %0 = vector.broadcast %cst : f32 to vector<16x435xf32>
    %c0 = arith.constant 0 : index
    %c0_0 = arith.constant 0 : index
    %1 = vector.load %arg12[%c0, %c0_0] : memref<16x435xf32, #tpu.memory_space<vmem>>, vector<16x435xf32>
    tpu.vector_store %arg12[%c0, %c0_0], %0 {strides = array<i32>} : memref<16x435xf32, #tpu.memory_space<vmem>>, vector<16x435xf32>,
    %c0_1 = arith.constant 0 : index
    %c0_2 = arith.constant 0 : index
    %c0_3 = arith.constant 0 : index
    %2 = vector.load %arg1[%c0_1, %c0_2, %c0_3] : memref<1x8x64xf32, #tpu.memory_space<vmem>>, vector<1x8x64xf32>
    %3 = vector.shape_cast %2 : vector<1x8x64xf32> to vector<8x64xf32>
    %c0_4 = arith.constant 0 : index
    %c0_5 = arith.constant 0 : index
    %4 = vector.load %arg3[%c0_4, %c0_5] : memref<64x288xf32, #tpu.memory_space<vmem>>, vector<64x288xf32>
    %cst_6 = arith.constant dense<0.000000e+00> : vector<8x288xf32>
    %5 = tpu.matmul %3, %4, %cst_6 {dimension_numbers = #tpu.dot_dimension_numbers<[1], [0], [0], [1], [0, 0, 1, 1], [], []>} : vector<8x64xf32>, vector<64x288xf32>, vector<8x288xf32> -> vector<8x288xf32>
    %c0_7 = arith.constant 0 : index
    %c128 = arith.constant 128 : index
    %6 = vector.load %arg12[%c0_7, %c128] : memref<16x435xf32, #tpu.memory_space<vmem>>, vector<8x288xf32>
    tpu.vector_store %arg12[%c0_7, %c128], %5 {strides = array<i32>} : memref<16x435xf32, #tpu.memory_space<vmem>>, vector<8x288xf32>,
    %c0_8 = arith.constant 0 : index
    %c0_9 = arith.constant 0 : index
    %c0_10 = arith.constant 0 : index
    %7 = vector.load %arg2[%c0_8, %c0_9, %c0_10] : memref<1x8x288xf32, #tpu.memory_space<vmem>>, vector<1x8x288xf32>
    %8 = vector.shape_cast %7 : vector<1x8x288xf32> to vector<8x288xf32>
    %c8 = arith.constant 8 : index
    %c128_11 = arith.constant 128 : index
    %9 = vector.load %arg12[%c8, %c128_11] : memref<16x435xf32, #tpu.memory_space<vmem>>, vector<8x288xf32>
    tpu.vector_store %arg12[%c8, %c128_11], %8 {strides = array<i32>} : memref<16x435xf32, #tpu.memory_space<vmem>>, vector<8x288xf32>,
    %c0_12 = arith.constant 0 : index
    %c0_13 = arith.constant 0 : index
    %10 = vector.load %arg4[%c0_12, %c0_13] : memref<1x288xf32, #tpu.memory_space<vmem>>, vector<1x288xf32>
    %c0_14 = arith.constant 0 : index
    %c109 = arith.constant 109 : index
    %11 = vector.load %arg12[%c0_14, %c109] : memref<16x435xf32, #tpu.memory_space<vmem>>, vector<16x288xf32>
    %c0_15 = arith.constant 0 : index
    %c110 = arith.constant 110 : index
    %12 = vector.load %arg12[%c0_15, %c110] : memref<16x435xf32, #tpu.memory_space<vmem>>, vector<16x288xf32>
    %c0_16 = arith.constant 0 : index
    %c111 = arith.constant 111 : index
    %13 = vector.load %arg12[%c0_16, %c111] : memref<16x435xf32, #tpu.memory_space<vmem>>, vector<16x288xf32>
    %c0_17 = arith.constant 0 : index
    %c127 = arith.constant 127 : index
    %14 = vector.load %arg12[%c0_17, %c127] : memref<16x435xf32, #tpu.memory_space<vmem>>, vector<16x288xf32>
    %c0_18 = arith.constant 0 : index
    %c128_19 = arith.constant 128 : index
    %15 = vector.load %arg12[%c0_18, %c128_19] : memref<16x435xf32, #tpu.memory_space<vmem>>, vector<16x288xf32>
    %c0_20 = arith.constant 0 : index
    %c129 = arith.constant 129 : index
    %16 = vector.load %arg12[%c0_20, %c129] : memref<16x435xf32, #tpu.memory_space<vmem>>, vector<16x288xf32>
    %c0_21 = arith.constant 0 : index
    %c145 = arith.constant 145 : index
    %17 = vector.load %arg12[%c0_21, %c145] : memref<16x435xf32, #tpu.memory_space<vmem>>, vector<16x288xf32>
    %c0_22 = arith.constant 0 : index
    %c146 = arith.constant 146 : index
    %18 = vector.load %arg12[%c0_22, %c146] : memref<16x435xf32, #tpu.memory_space<vmem>>, vector<16x288xf32>
    %c0_23 = arith.constant 0 : index
    %c147 = arith.constant 147 : index
    %19 = vector.load %arg12[%c0_23, %c147] : memref<16x435xf32, #tpu.memory_space<vmem>>, vector<16x288xf32>
    %20 = tpu.concatenate %11, %12, %13, %14, %15, %16, %17, %18, %19 in 0 : vector<16x288xf32>, vector<16x288xf32>, vector<16x288xf32>, vector<16x288xf32>, vector<16x288xf32>, vector<16x288xf32>, vector<16x288xf32>, vector<16x288xf32>, vector<16x288xf32> -> vector<144x288xf32>
    %c0_24 = arith.constant 0 : index
    %c0_25 = arith.constant 0 : index
    %21 = vector.load %arg5[%c0_24, %c0_25] : memref<8x144xf32, #tpu.memory_space<vmem>>, vector<8x144xf32>
    %cst_26 = arith.constant dense<0.000000e+00> : vector<8x288xf32>
    %22 = tpu.matmul %21, %20, %cst_26 {dimension_numbers = #tpu.dot_dimension_numbers<[1], [0], [0], [1], [0, 0, 1, 1], [], []>} : vector<8x144xf32>, vector<144x288xf32>, vector<8x288xf32> -> vector<8x288xf32>
    %c0_27 = arith.constant 0 : index
    %c0_28 = arith.constant 0 : index
    %23 = vector.load %arg6[%c0_27, %c0_28] : memref<8x1xf32, #tpu.memory_space<vmem>>, vector<8x1xf32>
    %24 = vector.broadcast %23 : vector<8x1xf32> to vector<8x288xf32>
    %25 = arith.addf %22, %24 : vector<8x288xf32>
    %cst_29 = arith.constant 0.000000e+00 : f32
    %26 = vector.broadcast %cst_29 : f32 to vector<8x288xf32>
    %27 = arith.cmpf ogt, %25, %26 : vector<8x288xf32>
    %cst_30 = arith.constant 0.00999999977 : f32
    %28 = vector.broadcast %cst_30 : f32 to vector<8x288xf32>
    %29 = arith.mulf %28, %25 : vector<8x288xf32>
    %30 = arith.select %27, %25, %29 : vector<8x288xi1>, vector<8x288xf32>
    %31 = vector.broadcast %10 : vector<1x288xf32> to vector<8x288xf32>
    %32 = arith.mulf %30, %31 : vector<8x288xf32>
    %c0_31 = arith.constant 0 : index
    %c128_32 = arith.constant 128 : index
    %33 = vector.load %arg12[%c0_31, %c128_32] : memref<16x435xf32, #tpu.memory_space<vmem>>, vector<8x288xf32>
    tpu.vector_store %arg12[%c0_31, %c128_32], %32 {strides = array<i32>} : memref<16x435xf32, #tpu.memory_space<vmem>>, vector<8x288xf32>,
    %c0_33 = arith.constant 0 : index
    %c109_34 = arith.constant 109 : index
    %34 = vector.load %arg12[%c0_33, %c109_34] : memref<16x435xf32, #tpu.memory_space<vmem>>, vector<8x288xf32>
    %c0_35 = arith.constant 0 : index
    %c110_36 = arith.constant 110 : index
    %35 = vector.load %arg12[%c0_35, %c110_36] : memref<16x435xf32, #tpu.memory_space<vmem>>, vector<8x288xf32>
    %c0_37 = arith.constant 0 : index
    %c111_38 = arith.constant 111 : index
    %36 = vector.load %arg12[%c0_37, %c111_38] : memref<16x435xf32, #tpu.memory_space<vmem>>, vector<8x288xf32>
    %c0_39 = arith.constant 0 : index
    %c127_40 = arith.constant 127 : index
    %37 = vector.load %arg12[%c0_39, %c127_40] : memref<16x435xf32, #tpu.memory_space<vmem>>, vector<8x288xf32>
    %c0_41 = arith.constant 0 : index
    %c128_42 = arith.constant 128 : index
    %38 = vector.load %arg12[%c0_41, %c128_42] : memref<16x435xf32, #tpu.memory_space<vmem>>, vector<8x288xf32>
    %c0_43 = arith.constant 0 : index
    %c129_44 = arith.constant 129 : index
    %39 = vector.load %arg12[%c0_43, %c129_44] : memref<16x435xf32, #tpu.memory_space<vmem>>, vector<8x288xf32>
    %c0_45 = arith.constant 0 : index
    %c145_46 = arith.constant 145 : index
    %40 = vector.load %arg12[%c0_45, %c145_46] : memref<16x435xf32, #tpu.memory_space<vmem>>, vector<8x288xf32>
    %c0_47 = arith.constant 0 : index
    %c146_48 = arith.constant 146 : index
    %41 = vector.load %arg12[%c0_47, %c146_48] : memref<16x435xf32, #tpu.memory_space<vmem>>, vector<8x288xf32>
    %c0_49 = arith.constant 0 : index
    %c147_50 = arith.constant 147 : index
    %42 = vector.load %arg12[%c0_49, %c147_50] : memref<16x435xf32, #tpu.memory_space<vmem>>, vector<8x288xf32>
    %43 = tpu.concatenate %34, %35, %36, %37, %38, %39, %40, %41, %42 in 0 : vector<8x288xf32>, vector<8x288xf32>, vector<8x288xf32>, vector<8x288xf32>, vector<8x288xf32>, vector<8x288xf32>, vector<8x288xf32>, vector<8x288xf32>, vector<8x288xf32> -> vector<72x288xf32>
    %c0_51 = arith.constant 0 : index
    %c0_52 = arith.constant 0 : index
    %44 = vector.load %arg7[%c0_51, %c0_52] : memref<8x72xf32, #tpu.memory_space<vmem>>, vector<8x72xf32>
    %cst_53 = arith.constant dense<0.000000e+00> : vector<8x288xf32>
    %45 = tpu.matmul %44, %43, %cst_53 {dimension_numbers = #tpu.dot_dimension_numbers<[1], [0], [0], [1], [0, 0, 1, 1], [], []>} : vector<8x72xf32>, vector<72x288xf32>, vector<8x288xf32> -> vector<8x288xf32>
    %c0_54 = arith.constant 0 : index
    %c0_55 = arith.constant 0 : index
    %46 = vector.load %arg8[%c0_54, %c0_55] : memref<8x1xf32, #tpu.memory_space<vmem>>, vector<8x1xf32>
    %47 = vector.broadcast %46 : vector<8x1xf32> to vector<8x288xf32>
    %48 = arith.addf %45, %47 : vector<8x288xf32>
    %cst_56 = arith.constant 0.000000e+00 : f32
    %49 = vector.broadcast %cst_56 : f32 to vector<8x288xf32>
    %50 = arith.cmpf ogt, %48, %49 : vector<8x288xf32>
    %cst_57 = arith.constant 0.00999999977 : f32
    %51 = vector.broadcast %cst_57 : f32 to vector<8x288xf32>
    %52 = arith.mulf %51, %48 : vector<8x288xf32>
    %53 = arith.select %50, %48, %52 : vector<8x288xi1>, vector<8x288xf32>
    %c0_58 = arith.constant 0 : index
    %c0_59 = arith.constant 0 : index
    %54 = vector.load %arg9[%c0_58, %c0_59] : memref<8x8xf32, #tpu.memory_space<vmem>>, vector<8x8xf32>
    %cst_60 = arith.constant dense<0.000000e+00> : vector<8x288xf32>
    %55 = tpu.matmul %54, %5, %cst_60 {dimension_numbers = #tpu.dot_dimension_numbers<[1], [0], [0], [1], [0, 0, 1, 1], [], []>} : vector<8x8xf32>, vector<8x288xf32>, vector<8x288xf32> -> vector<8x288xf32>
    %c0_61 = arith.constant 0 : index
    %c0_62 = arith.constant 0 : index
    %56 = vector.load %arg10[%c0_61, %c0_62] : memref<8x1xf32, #tpu.memory_space<vmem>>, vector<8x1xf32>
    %57 = vector.broadcast %56 : vector<8x1xf32> to vector<8x288xf32>
    %58 = arith.addf %55, %57 : vector<8x288xf32>
    %59 = arith.addf %53, %58 : vector<8x288xf32>
    %cst_63 = arith.constant 0.000000e+00 : f32
    %60 = vector.broadcast %cst_63 : f32 to vector<8x288xf32>
    %61 = arith.maximumf %59, %60 : vector<8x288xf32>
    %c0_64 = arith.constant 0 : index
    %c0_65 = arith.constant 0 : index
    %c0_66 = arith.constant 0 : index
    %62 = vector.load %arg11[%c0_64, %c0_65, %c0_66] : memref<1x8x288xf32, #tpu.memory_space<vmem>>, vector<1x8x288xf32>
    %63 = vector.shape_cast %62 : vector<1x8x288xf32> to vector<8x288xf32>
    %64 = vector.shape_cast %61 : vector<8x288xf32> to vector<1x8x288xf32>
    tpu.vector_store %arg11[%c0_64, %c0_65, %c0_66], %64 {strides = array<i32>} : memref<1x8x288xf32, #tpu.memory_space<vmem>>, vector<1x8x288xf32>,
    return
  }
  func.func @transform_0(%arg0: i32) -> (i32, i32, i32) {
    %c0_i32 = arith.constant 0 : i32
    %c0_i32_0 = arith.constant 0 : i32
    %c0_i32_1 = arith.constant 0 : i32
    return %arg0, %c0_i32, %c0_i32_0 : i32, i32, i32
  }
  func.func @transform_1(%arg0: i32) -> (i32, i32, i32) {
    %c0_i32 = arith.constant 0 : i32
    %c0_i32_0 = arith.constant 0 : i32
    %c0_i32_1 = arith.constant 0 : i32
    return %arg0, %c0_i32, %c0_i32_0 : i32, i32, i32
  }
  func.func @transform_2(%arg0: i32) -> (i32, i32) {
    %c0_i32 = arith.constant 0 : i32
    %c0_i32_0 = arith.constant 0 : i32
    %c0_i32_1 = arith.constant 0 : i32
    return %c0_i32, %c0_i32_0 : i32, i32
  }
  func.func @transform_3(%arg0: i32) -> (i32, i32) {
    %c0_i32 = arith.constant 0 : i32
    %c0_i32_0 = arith.constant 0 : i32
    %c0_i32_1 = arith.constant 0 : i32
    return %c0_i32, %c0_i32_0 : i32, i32
  }
  func.func @transform_4(%arg0: i32) -> (i32, i32) {
    %c0_i32 = arith.constant 0 : i32
    %c0_i32_0 = arith.constant 0 : i32
    %c0_i32_1 = arith.constant 0 : i32
    return %c0_i32, %c0_i32_0 : i32, i32
  }
  func.func @transform_5(%arg0: i32) -> (i32, i32) {
    %c0_i32 = arith.constant 0 : i32
    %c0_i32_0 = arith.constant 0 : i32
    %c0_i32_1 = arith.constant 0 : i32
    return %c0_i32, %c0_i32_0 : i32, i32
  }
  func.func @transform_6(%arg0: i32) -> (i32, i32) {
    %c0_i32 = arith.constant 0 : i32
    %c0_i32_0 = arith.constant 0 : i32
    %c0_i32_1 = arith.constant 0 : i32
    return %c0_i32, %c0_i32_0 : i32, i32
  }
  func.func @transform_7(%arg0: i32) -> (i32, i32) {
    %c0_i32 = arith.constant 0 : i32
    %c0_i32_0 = arith.constant 0 : i32
    %c0_i32_1 = arith.constant 0 : i32
    return %c0_i32, %c0_i32_0 : i32, i32
  }
  func.func @transform_8(%arg0: i32) -> (i32, i32) {
    %c0_i32 = arith.constant 0 : i32
    %c0_i32_0 = arith.constant 0 : i32
    %c0_i32_1 = arith.constant 0 : i32
    return %c0_i32, %c0_i32_0 : i32, i32
  }
  func.func @transform_9(%arg0: i32) -> (i32, i32) {
    %c0_i32 = arith.constant 0 : i32
    %c0_i32_0 = arith.constant 0 : i32
    %c0_i32_1 = arith.constant 0 : i32
    return %c0_i32, %c0_i32_0 : i32, i32
  }
  func.func @transform_10(%arg0: i32) -> (i32, i32, i32) {
    %c0_i32 = arith.constant 0 : i32
    %c0_i32_0 = arith.constant 0 : i32
    %c0_i32_1 = arith.constant 0 : i32
    return %arg0, %c0_i32, %c0_i32_0 : i32, i32, i32
  }
}

</mosaic_0001>

<bundles_post_ra>
// kernel: decode_res_block_2d.1
= control target key start
LH: loop header
LB: loop body
LE: loop exit
PB: predicated region body
PF: predicated region fallthrough
CT: control target
= control target key end

     0   :  { %s2519_s13 = smov 0   ;;  %s3223_s0 = inlined_call_operand.vmem [shape: f32[2,8,64], index: 0, kind: input, shape index: {}]   ;;  %s3224_s1 = inlined_call_operand.vmem [shape: f32[2,8,288], index: 1, kind: input, shape index: {}]   ;;  %s3225_s2 = inlined_call_operand.vmem [shape: f32[64,288], index: 2, kind: input, shape index: {}]   ;;  %s3226_s3 = inlined_call_operand.vmem [shape: f32[1,288], index: 3, kind: input, shape index: {}]   ;;  %s3227_s4 = inlined_call_operand.vmem [shape: f32[8,144], index: 4, kind: input, shape index: {}]   ;;  %s3228_s5 = inlined_call_operand.vmem [shape: f32[8,1], index: 5, kind: input, shape index: {}]   ;;  %s3229_s6 = inlined_call_operand.vmem [shape: f32[8,72], index: 6, kind: input, shape index: {}]   ;;  %s3230_s7 = inlined_call_operand.vmem [shape: f32[8,1], index: 7, kind: input, shape index: {}]   ;;  %s3231_s8 = inlined_call_operand.vmem [shape: f32[8,8], index: 8, kind: input, shape index: {}]   ;;  %s3232_s9 = inlined_call_operand.vmem [shape: f32[8,1], index: 9, kind: input, shape index: {}]   ;;  %s3233_s10 = inlined_call_operand.vmem [shape: f32[2,8,288], index: 10, kind: output, shape index: {}]  }
   0x1 LB: > { %s1770_s14 = sadd.s32 4294967295, %s2449_s13   ;;  %p1774_p0 = scmp.ge.s32.totalorder %s2449_s13, 1  ;;  %s2449_s13 = sphi %s2519_s13, %s20_s13  }
   0x2   : > { %p321_p1 = scmp.lt.s32.totalorder %s2449_s13, 3 }
   0x4   : > { %p322_p2 = pnand %p1774_p0, %p321_p1 }
   0x5   : > { %v389_v0 = vld [vmem:[%s3225_s2 + $0x10] sm:$0xff] (!%p322_p2)  ;;  %v392_v1 = vld [vmem:[%s3225_s2 + $0x28] sm:$0xff] (!%p322_p2)  ;;  %v395_v2 = vld [vmem:[%s3225_s2 + $0x40] sm:$0xff] (!%p322_p2)  ;;  %v2451_v3 = vmov (!%p322_p2), 0.0|0.0   ;;  %vm2452_vm0 = vmmov (!%p322_p2), 0   ;;  %v2453_v6 = vmov (!%p322_p2), 0.0  }
   0x6   : > { %325 = sbr.rel (%p322_p2) target bundleno = 1307 (0x51b), region = 60  ;;  %1870 = vmatprep.subr.bf16.mxu1 (!%p322_p2), %v2451_v3  ;;  %v1871_v4 = vpack.c.bf16 (!%p322_p2), %v392_v1, %v389_v0  ;;  %v398_v5 = vld [vmem:[%s3225_s2 + $0x58] sm:$0xff] (!%p322_p2)  ;;  %1825 = vmatprep.mubr.msk.f32.mxu1 (!%p322_p2), %vm2452_vm0, %v2453_v6  ;;  %377 = vst [vmem:[#allocation2] sm:$0xff] (!%p322_p2), %v2453_v6  ;;  %p2545_p3 = scmp.lt.s32.totalorder (!%p322_p2), %s1770_s14, 1  ;;  %vm380_vm1 = vcmask (!%p322_p2), 416768   ;;  %v388_v7 = vld [vmem:[%s3225_s2 + $0x8] sm:$0xff] (!%p322_p2) }
   0x7   : > { %v391_v8 = vld [vmem:[%s3225_s2 + $0x20] sm:$0xff] (!%p322_p2)  ;;  %385 = vst.msk [vmem:[#allocation2 + $0x38] sm:$0xff] (!%p322_p2), %vm380_vm1, %v2453_v6  ;;  %381 = vst.msk [vmem:[#allocation2 + $0x18] sm:$0xff] (!%p322_p2), %vm380_vm1, %v2453_v6  ;;  %479 = vmatprep.mubr.f32.mxu0 (!%p322_p2), %v2453_v6  ;;  %v1874_v10 = vpack.c.bf16 (!%p322_p2), %v398_v5, %v395_v2  ;;  %v401_v11 = vld [vmem:[%s3225_s2 + $0x70] sm:$0xff] (!%p322_p2)  ;;  %s2454_s18 = smov (!%p322_p2), 127   ;;  %vm558_vm2 = vcmask (!%p322_p2), 261120  }
   0x8   : > { %v387_v9 = vld [vmem:[%s3225_s2] sm:$0xff] (!%p322_p2)  ;;  %1872 = vmatpush3.bf16.msra.mxu1 (!%p322_p2), %v1871_v4  ;;  %v404_v12 = vld [vmem:[%s3225_s2 + $0x88] sm:$0xff] (!%p322_p2)  ;;  %v1854_v13 = vpack.c.bf16 (!%p322_p2), %v391_v8, %v388_v7  ;;  %v390_v14 = vld [vmem:[%s3225_s2 + $0x18] sm:$0xff] (!%p322_p2)  ;;  %1996 = vrot.lane.b32.xlu1 (!%p322_p2), %v2453_v6, %s2454_s18  ;;  %s2455_s11 = smov (!%p322_p2), 126   ;;  %vm411_vm3 = vcmask (!%p322_p2), 523264   ;;  %s2457_s23 = smov (!%p322_p2), 109  }
   0x9   : > { %1873 = vmatprep.subr.bf16.mxu1 (!%p322_p2), %v2451_v3  ;;  %v1856_v15 = vpack.c.bf16 (!%p322_p2), %v390_v14, %v387_v9  ;;  %v394_v16 = vld [vmem:[%s3225_s2 + $0x38] sm:$0xff] (!%p322_p2)  ;;  %v397_v17 = vld [vmem:[%s3225_s2 + $0x50] sm:$0xff] (!%p322_p2)  ;;  %v396_v20 = vld [vmem:[%s3225_s2 + $0x48] sm:$0xff] (!%p322_p2)  ;;  %v1877_v27 = vpack.c.bf16 (!%p322_p2), %v404_v12, %v401_v11  ;;  %s2458_s25 = smov (!%p322_p2), 92   ;;  %s2459_s26 = smov (!%p322_p2), 108   ;;  %vm599_vm4 = vcmask (!%p322_p2), 1039360  }
   0xa   : > { %v393_v18 = vld [vmem:[%s3225_s2 + $0x30] sm:$0xff] (!%p322_p2)  ;;  %1855 = vmatprep.subr.bf16.mxu0 (!%p322_p2), %v1854_v13  ;;  %v1858_v19 = vpack.c.bf16 (!%p322_p2), %v397_v17, %v394_v16  ;;  %v400_v21 = vld [vmem:[%s3225_s2 + $0x68] sm:$0xff] (!%p322_p2)  ;;  %v403_v22 = vld [vmem:[%s3225_s2 + $0x80] sm:$0xff] (!%p322_p2)  ;;  %s2460_s28 = smov (!%p322_p2), 90   ;;  %s2461_s29 = smov (!%p322_p2), 91   ;;  %vm622_vm5 = vcmask (!%p322_p2), 1031168  }
   0xb   : > { %1857 = vmatpush1.bf16.msra.mxu0 (!%p322_p2), %v1856_v15  ;;  %v407_v23 = vld [vmem:[%s3225_s2 + $0xa0] sm:$0xff] (!%p322_p2)  ;;  %v410_v24 = vld [vmem:[%s3225_s2 + $0xb8] sm:$0xff] (!%p322_p2)  ;;  %v1860_v25 = vpack.c.bf16 (!%p322_p2), %v396_v20, %v393_v18  ;;  %v1862_v28 = vpack.c.bf16 (!%p322_p2), %v403_v22, %v400_v21  ;;  %v409_v31 = vld [vmem:[%s3225_s2 + $0xb0] sm:$0xff] (!%p322_p2)  ;;  %s2462_s30 = smov (!%p322_p2), 19   ;;  %vm645_vm6 = vcmask (!%p322_p2), 900096   ;;  %vm664_vm7 = vcmask (!%p322_p2), 891904  }
   0xc   : > { %v399_v26 = vld [vmem:[%s3225_s2 + $0x60] sm:$0xff] (!%p322_p2)  ;;  %1875 = vmatpush3.bf16.msra.mxu1 (!%p322_p2), %v1874_v10  ;;  %1859 = vmatprep.subr.bf16.mxu0 (!%p322_p2), %v1858_v19  ;;  %v402_v29 = vld [vmem:[%s3225_s2 + $0x78] sm:$0xff] (!%p322_p2)  ;;  %v1880_v36 = vpack.c.bf16 (!%p322_p2), %v410_v24, %v407_v23  ;;  %v405_v38 = vld [vmem:[%s3225_s2 + $0x90] sm:$0xff] (!%p322_p2)  ;;  %vm681_vm8 = vcmask (!%p322_p2), 883712   ;;  %vm698_vm9 = vcmask (!%p322_p2), 752640   ;;  %vm715_vm10 = vcmask (!%p322_p2), 744448  }
   0xd   : > { %s3242_s14 = smov (!%p2545_p3, %s1770_s14), 1  ;;  %v406_v30 = vld [vmem:[%s3225_s2 + $0x98] sm:$0xff]  ;;  %1876 = vmatprep.subr.bf16.mxu1 %v2451_v3  ;;  %2001 = vrot.lane.b32.xlu1 %v2453_v6, %s2455_s11  ;;  %v1864_v35 = vpack.c.bf16 %v402_v29, %v399_v26  ;;  %v408_v39 = vld [vmem:[%s3225_s2 + $0xa8] sm:$0xff]  ;;  %vm732_vm11 = vcmask 736256   ;;  %vm889_vm12 = vcmask 154624   ;;  %vm998_vm13 = vcmask 130048  }
   0xe   : > { %s1973_s27 = smul.u32 24, %s3242_s14  ;;  %s1775_s12 = sshll.u32 %s3242_s14, 3  ;;  %v1866_v37 = vpack.c.bf16 %v409_v31, %v406_v30  ;;  %v1868_v40 = vpack.c.bf16 %v408_v39, %v405_v38 }
   0xf   : > { %1861 = vmatpush1.bf16.msra.mxu0 %v1860_v25  ;;  %s366_s22 = scalar_lea.vmem %s3223_s0, %s1775_s12 }
  0x10   : > { %s371_s24 = scalar_lea.vmem %s3224_s1, %s1973_s27  ;;  %1878 = vmatpush3.bf16.msra.mxu1 %v1877_v27  ;;  %1863 = vmatprep.subr.bf16.mxu0 %v1862_v28  ;;  %v386_v41 = vld [vmem:[%s366_s22] sm:$0xff]  ;;  %s376_s15 = scalar_lea.vmem %s3233_s10, %s1973_s27 }
  0x11   : > { %v2622_v32 = vld [vmem:[%s371_s24] sm:$0xff]  ;;  %v2624_v33 = vld [vmem:[%s371_s24 + $0x8] sm:$0xff]  ;;  %v562_v34 = vld [vmem:[%s371_s24 + $0x10] sm:$0xff]  ;;  %1879 = vmatprep.subr.bf16.mxu1 %v2451_v3  ;;  %s2456_s24 = smov 110  }
  0x12   : > { %565 = vst.msk [vmem:[#allocation2 + $0x38] sm:$0xff] %vm558_vm2, %v562_v34  ;;  %2006 = vrot.lane.b32.xlu1 %v2453_v6, %s2456_s24  ;;  %v2110_v51 = vpack.i.bf16 %v2624_v33, %v2622_v32 }
  0x13   : > { %1865 = vmatpush1.bf16.msra.mxu0 %v1864_v35 }
  0x14   : > { %1881 = vmatpush3.bf16.msra.mxu1 %v1880_v36  ;;  %1867 = vmatprep.subr.bf16.mxu0 %v1866_v37 }
  0x15   : > { %1918 = vmatprep.subr.bf16.mxu1 %v2451_v3 }
  0x17   : > { %1826 = vmatmul.mubr.msk.f32.vlgmr.msra.gmra.mrb[0].mxu1 %vm411_vm3, %v386_v41  ;;  %1869 = vmatpush1.bf16.msra.mxu0 %v1868_v40 }
  0x19   : > { %v574_v42 = vld [vmem:[#allocation2 + $0x38] sm:$0xff] }
  0x1a   : > { %v2015_v43 = vpack.i.bf16 %v574_v42, %v2624_v33  ;;  %1778 = vmatmul.mubr.msk.f32.vlgmr.msra.gmra.mrb[0].mxu0 %vm411_vm3, %v386_v41  ;;  %vm1388_vm3 = vcmask 588800  }
  0x1c   : > { %2016 = vrot.lane.b32.xlu0 %v2015_v43, %s2455_s11  ;;  %2011 = vrot.lane.b32.xlu1 %v2015_v43, %s2454_s18 }
  0x20   : > { %2021 = vrot.lane.b32.xlu0 %v2015_v43, %s2456_s24  ;;  %2031 = vrot.lane.b32.xlu1 %v2015_v43, %s2459_s26 }
  0x24   : > { %2026 = vrot.lane.b32.xlu0 %v2015_v43, %s2457_s23  ;;  %2041 = vrot.lane.b32.xlu1 %v2015_v43, %s2461_s29 }
  0x28   : > { %2036 = vrot.lane.b32.xlu0 %v2015_v43, %s2458_s25 }
  0x2c   : > { %2046 = vrot.lane.b32.xlu0 %v2015_v43, %s2460_s28 }
  0x7a   : > { %v2686_v53 = vpop.permute.xlu1 %1996 }
  0x7f   : > { %v2688_v54 = vpop.permute.xlu1 %2001 }
  0x84   : > { %v2692_v56 = vpop.permute.xlu1 %2006 }
  0x8e   : > { %v2690_v55 = vpop.permute.xlu0 %2016  ;;  %v2698_v59 = vpop.permute.xlu1 %2011 }
  0x8f   : > { %v2014_v0 = vunpack.i.h.bf16 %v2698_v59  ;;  %v2013_v1 = vunpack.i.l.bf16 %v2698_v59  ;;  %v2019_v7 = vunpack.i.h.bf16 %v2690_v55  ;;  %v2018_v8 = vunpack.i.l.bf16 %v2690_v55 }
  0x90   : > { %v2003_v55 = vunpack.i.l.bf16 %v2688_v54 }
  0x91   : > { %v605_v10 = vsel %vm599_vm4, %v2013_v1, %v2014_v0  ;;  %v628_v18 = vsel %vm622_vm5, %v2018_v8, %v2019_v7 }
  0x92   : > { %v2694_v57 = vpop.permute.xlu0 %2021  ;;  %v2702_v61 = vpop.permute.xlu1 %2031 }
  0x93   : > { %v2024_v16 = vunpack.i.h.bf16 %v2694_v57  ;;  %v2023_v17 = vunpack.i.l.bf16 %v2694_v57  ;;  %v2033_v33 = vunpack.i.l.bf16 %v2702_v61 }
  0x95   : > { %v651_v26 = vsel %vm645_vm6, %v2023_v17, %v2024_v16 }
  0x96   : > { %v2696_v58 = vpop.permute.xlu0 %2026  ;;  %v2706_v63 = vpop.permute.xlu1 %2041 }
  0x97   : > { %v2029_v24 = vunpack.i.h.bf16 %v2696_v58  ;;  %v2028_v25 = vunpack.i.l.bf16 %v2696_v58 }
  0x99   : > { %v668_v34 = vsel %vm664_vm7, %v2028_v25, %v2029_v24 }
  0x9a   : > { %v2700_v60 = vpop.permute.xlu0 %2036 }
  0x9b   : > { %v2039_v40 = vunpack.i.h.bf16 %v2700_v60  ;;  %v2038_v41 = vunpack.i.l.bf16 %v2700_v60 }
  0x9e   : > { %v2704_v62 = vpop.permute.xlu0 %2046 }
  0xea   : > { %v2652_v44 = vpop.f32.mrb[0].mxu1 }
  0xeb   : > { %559 = vst.msk [vmem:[#allocation2 + $0x18] sm:$0xff] %vm558_vm2, %v2652_v44  ;;  %v1827_v45 = vpop.f32.mrb[1].mxu1 }
  0xed   : > { %v2656_v46 = vpop.f32.mrb[0].mxu0 }
  0xee   : > { %v2658_v47 = vpop.f32.mrb[1].mxu0 }
  0xef   : > { %v2090_v48 = vpack.i.bf16 %v2658_v47, %v2656_v46 }
  0xf2   : > { %v570_v49 = vld [vmem:[#allocation2 + $0x18] sm:$0xff] }
  0xf3   : > { %v2055_v50 = vpack.i.bf16 %v2622_v32, %v570_v49  ;;  %v2130_v52 = vpack.i.bf16 %v574_v42, %v570_v49  ;;  %v2034_v32 = vunpack.i.h.bf16 %v2702_v61 }
  0xf5   : > { %2056 = vrot.lane.b32.xlu1 %v2055_v50, %s2455_s11  ;;  %2051 = vrot.lane.b32.xlu0 %v2055_v50, %s2454_s18  ;;  %v685_v42 = vsel %vm681_vm8, %v2033_v33, %v2034_v32 }
  0xf9   : > { %2061 = vrot.lane.b32.xlu1 %v2055_v50, %s2456_s24  ;;  %2071 = vrot.lane.b32.xlu0 %v2055_v50, %s2459_s26 }
  0xfd   : > { %2066 = vrot.lane.b32.xlu1 %v2055_v50, %s2457_s23  ;;  %2081 = vrot.lane.b32.xlu0 %v2055_v50, %s2461_s29 }
 0x101   : > { %2076 = vrot.lane.b32.xlu1 %v2055_v50, %s2458_s25  ;;  %2091 = vrot.lane.b32.xlu0 %v2090_v48, %s2454_s18 }
 0x105   : > { %2086 = vrot.lane.b32.xlu1 %v2055_v50, %s2460_s28  ;;  %2096 = vrot.lane.b32.xlu0 %v2090_v48, %s2455_s11 }
 0x109   : > { %2116 = vrot.lane.b32.xlu1 %v2453_v6, %s2462_s30  ;;  %2101 = vrot.lane.b32.xlu0 %v2090_v48, %s2456_s24 }
 0x10d   : > { %2121 = vrot.lane.b32.xlu1 %v2090_v48, %s2459_s26  ;;  %2106 = vrot.lane.b32.xlu0 %v2090_v48, %s2457_s23 }
 0x111   : > { %2136 = vrot.lane.b32.xlu1 %v2090_v48, %s2461_s29  ;;  %2111 = vrot.lane.b32.xlu0 %v2110_v51, %s2462_s30  ;;  %v2044_v51 = vunpack.i.h.bf16 %v2706_v63 }
 0x115   : > { %2186 = vrot.lane.b32.xlu1 %v2090_v48, %s2462_s30  ;;  %2126 = vrot.lane.b32.xlu0 %v2090_v48, %s2458_s25 }
 0x119   : > { %2131 = vrot.lane.b32.xlu0 %v2130_v52, %s2462_s30  ;;  %v2043_v52 = vunpack.i.l.bf16 %v2706_v63 }
 0x11d   : > { %2141 = vrot.lane.b32.xlu0 %v2090_v48, %s2460_s28 }
 0x167   : > { %v2710_v2 = vpop.permute.xlu1 %2056  ;;  %v2712_v4 = vpop.permute.xlu0 %2051 }
 0x168   : > { %v2059_v5 = vunpack.i.h.bf16 %v2710_v2  ;;  %v2054_v6 = vunpack.i.h.bf16 %v2712_v4 }
 0x16a   : > { %v604_v9 = vsel %vm599_vm4, %v2054_v6, %v2013_v1  ;;  %v627_v15 = vsel %vm622_vm5, %v2059_v5, %v2018_v8  ;;  %v702_v1 = vsel %vm698_vm9, %v2038_v41, %v2039_v40 }
 0x16b   : > { %v2724_v11 = vpop.permute.xlu1 %2061  ;;  %v2726_v12 = vpop.permute.xlu0 %2071  ;;  %v2145_v13 = vpack.i.bf16 %v605_v10, %v604_v9  ;;  %v2150_v21 = vpack.i.bf16 %v628_v18, %v627_v15  ;;  %v2049_v18 = vunpack.i.h.bf16 %v2704_v62 }
 0x16c   : > { %v2064_v14 = vunpack.i.h.bf16 %v2724_v11  ;;  %v2074_v30 = vunpack.i.h.bf16 %v2726_v12 }
 0x16d   : > { %2146 = vrot.lane.b32.xlu0 %v2145_v13, %s2462_s30 }
 0x16e   : > { %v650_v23 = vsel %vm645_vm6, %v2064_v14, %v2023_v17  ;;  %v684_v39 = vsel %vm681_vm8, %v2074_v30, %v2033_v33 }
 0x16f   : > { %v2738_v19 = vpop.permute.xlu1 %2066  ;;  %v2740_v20 = vpop.permute.xlu0 %2081  ;;  %v2155_v29 = vpack.i.bf16 %v651_v26, %v650_v23  ;;  %v2165_v48 = vpack.i.bf16 %v685_v42, %v684_v39  ;;  %v719_v26 = vsel %vm715_vm10, %v2043_v52, %v2044_v51  ;;  %v2053_v42 = vunpack.i.l.bf16 %v2712_v4 }
 0x170   : > { %v2069_v22 = vunpack.i.h.bf16 %v2738_v19  ;;  %v2084_v49 = vunpack.i.h.bf16 %v2740_v20 }
 0x171   : > { %2151 = vrot.lane.b32.xlu0 %v2150_v21, %s2462_s30  ;;  %v2048_v21 = vunpack.i.l.bf16 %v2704_v62 }
 0x172   : > { %v667_v31 = vsel %vm664_vm7, %v2069_v22, %v2028_v25  ;;  %v718_v17 = vsel %vm715_vm10, %v2084_v49, %v2043_v52 }
 0x173   : > { %v2752_v27 = vpop.permute.xlu1 %2076  ;;  %v2754_v28 = vpop.permute.xlu0 %2091  ;;  %v2160_v37 = vpack.i.bf16 %v668_v34, %v667_v31  ;;  %v2175_v33 = vpack.i.bf16 %v719_v26, %v718_v17 }
 0x174   : > { %v2079_v38 = vunpack.i.h.bf16 %v2752_v27 }
 0x175   : > { %2156 = vrot.lane.b32.xlu0 %v2155_v29, %s2462_s30 }
 0x176   : > { %v701_v50 = vsel %vm698_vm9, %v2079_v38, %v2038_v41  ;;  %v736_v41 = vsel %vm732_vm11, %v2048_v21, %v2049_v18 }
 0x177   : > { %v2764_v35 = vpop.permute.xlu1 %2086  ;;  %v2766_v36 = vpop.permute.xlu0 %2096  ;;  %v2170_v10 = vpack.i.bf16 %v702_v1, %v701_v50 }
 0x178   : > { %v3234_v13 = vunpack.i.h.bf16 %v2764_v35  ;;  %v2099_v58 = vunpack.i.h.bf16 %v2766_v36 }
 0x179   : > { %2161 = vrot.lane.b32.xlu0 %v2160_v37, %s2462_s30 }
 0x17a   : > { %v735_v34 = vsel %vm732_vm11, %v3234_v13, %v2048_v21 }
 0x17b   : > { %v2117_v43 = vpop.permute.xlu1 %2116  ;;  %v2776_v45 = vpop.permute.xlu0 %2101  ;;  %v2180_v1 = vpack.i.bf16 %v736_v41, %v735_v34 }
 0x17d   : > { %2166 = vrot.lane.b32.xlu0 %v2165_v48, %s2462_s30  ;;  %v2119_v48 = vunpack.i.h.bf16 %v2117_v43 }
 0x17f   : > { %v2786_v8 = vpop.permute.xlu1 %2121  ;;  %v2788_v9 = vpop.permute.xlu0 %2106 }
 0x180   : > { %v3236_v15 = vunpack.i.l.bf16 %v2788_v9  ;;  %v3235_v23 = vunpack.i.l.bf16 %v2786_v8  ;;  %v2109_v60 = vunpack.i.h.bf16 %v2788_v9  ;;  %v2124_v63 = vunpack.i.h.bf16 %v2786_v8 }
 0x181   : > { %2171 = vrot.lane.b32.xlu0 %v2170_v10, %s2462_s30  ;;  %v2118_v10 = vunpack.i.l.bf16 %v2117_v43 }
 0x182   : > { %v2225_v25 = vpack.i.bf16 %v2069_v22, %v3236_v15  ;;  %v2230_v22 = vpack.i.bf16 %v2074_v30, %v3235_v23  ;;  %v2058_v30 = vunpack.i.l.bf16 %v2710_v2 }
 0x183   : > { %v2802_v29 = vpop.permute.xlu1 %2136  ;;  %v2112_v31 = vpop.permute.xlu0 %2111 }
 0x184   : > { %2226 = vrot.lane.b32.xlu1 %v2225_v25, %s2462_s30  ;;  %v2113_v37 = vunpack.i.l.bf16 %v2112_v31  ;;  %v2114_v39 = vunpack.i.h.bf16 %v2112_v31  ;;  %v2138_v31 = vunpack.i.l.bf16 %v2802_v29  ;;  %v2195_v59 = vpack.i.bf16 %v2019_v7, %v2058_v30 }
 0x185   : > { %2176 = vrot.lane.b32.xlu0 %v2175_v33, %s2462_s30  ;;  %v625_v4 = vsel %vm622_vm5, %v2099_v58, %v2058_v30 }
 0x186   : > { %v893_v21 = vsel %vm889_vm12, %v2119_v48, %v2113_v37  ;;  %v894_v41 = vsel %vm889_vm12, %v2113_v37, %v2114_v39 }
 0x187   : > { %v2187_v50 = vpop.permute.xlu1 %2186  ;;  %v2815_v52 = vpop.permute.xlu0 %2126 }
 0x188   : > { %v2189_v17 = vunpack.i.h.bf16 %v2187_v50  ;;  %v2188_v25 = vunpack.i.l.bf16 %v2187_v50  ;;  %v2128_v26 = vunpack.i.l.bf16 %v2815_v52  ;;  %2231 = vrot.lane.b32.xlu1 %v2230_v22, %s2462_s30  ;;  %v2190_v22 = vpack.i.bf16 %v2014_v0, %v2053_v42 }
 0x189   : > { %2181 = vrot.lane.b32.xlu0 %v2180_v1, %s2462_s30  ;;  %v2093_v50 = vunpack.i.l.bf16 %v2754_v28  ;;  %v2240_v0 = vpack.i.bf16 %v2084_v49, %v2138_v31  ;;  %v2004_v49 = vunpack.i.h.bf16 %v2688_v54 }
 0x18a   : > { %v890_v33 = vsel %vm889_vm12, %v2118_v10, %v2188_v25  ;;  %v2235_v34 = vpack.i.bf16 %v2079_v38, %v2128_v26  ;;  %v891_v43 = vsel %vm889_vm12, %v2188_v25, %v2189_v17  ;;  %v1999_v38 = vunpack.i.h.bf16 %v2686_v53 }
 0x18b   : > { %v1884_v13 = vpack.c.bf16 %v893_v21, %v890_v33  ;;  %v2132_v48 = vpop.permute.xlu0 %2131  ;;  %v1882_v23 = vpack.c.bf16 %v894_v41, %v891_v43  ;;  %v1998_v10 = vunpack.i.l.bf16 %v2686_v53  ;;  %v2063_v21 = vunpack.i.l.bf16 %v2724_v11 }
 0x18c   : > { %v2134_v1 = vunpack.i.h.bf16 %v2132_v48  ;;  %v2133_v15 = vunpack.i.l.bf16 %v2132_v48  ;;  %2236 = vrot.lane.b32.xlu1 %v2235_v34, %s2462_s30  ;;  %v2098_v53 = vunpack.i.l.bf16 %v2766_v36  ;;  %v603_v7 = vsel %vm599_vm4, %v1999_v38, %v2054_v6 }
 0x18d   : > { %2191 = vrot.lane.b32.xlu0 %v2190_v22, %s2462_s30  ;;  %1883 = vmatprep.subr.bf16.mxu0 %v1882_v23  ;;  %v600_v23 = vsel %vm599_vm4, %v1998_v10, %v2093_v50  ;;  %v2008_v43 = vunpack.i.l.bf16 %v2692_v56  ;;  %v626_v54 = vsel %vm622_vm5, %v2004_v49, %v2059_v5  ;;  %v2073_v6 = vunpack.i.l.bf16 %v2726_v12 }
 0x18e   : > { %v892_v37 = vsel %vm889_vm12, %v2189_v17, %v2133_v15  ;;  %v895_v25 = vsel %vm889_vm12, %v2114_v39, %v2134_v1  ;;  %1885 = vmatpush1.bf16.msra.mxu0 %v1884_v13  ;;  %v2245_v13 = vpack.i.bf16 %v603_v7, %v600_v23  ;;  %v2200_v15 = vpack.i.bf16 %v2024_v16, %v2063_v21 }
 0x18f   : > { %v1919_v33 = vpack.c.bf16 %v895_v25, %v892_v37  ;;  %v2068_v39 = vunpack.i.l.bf16 %v2738_v19  ;;  %v2103_v17 = vunpack.i.l.bf16 %v2776_v45  ;;  %v623_v34 = vsel %vm622_vm5, %v2003_v55, %v2098_v53 }
 0x190   : > { %2241 = vrot.lane.b32.xlu1 %v2240_v0, %s2462_s30  ;;  %v2250_v57 = vpack.i.bf16 %v626_v54, %v623_v34  ;;  %v2009_v16 = vunpack.i.h.bf16 %v2692_v56  ;;  %v2094_v41 = vunpack.i.h.bf16 %v2754_v28  ;;  %v2210_v12 = vpack.i.bf16 %v2034_v32, %v2073_v6 }
 0x191   : > { %2196 = vrot.lane.b32.xlu0 %v2195_v59, %s2462_s30  ;;  %1920 = vmatpush1.bf16.msra.mxu1 %v1919_v33  ;;  %v2205_v19 = vpack.i.bf16 %v2029_v24, %v2068_v39  ;;  %v646_v22 = vsel %vm645_vm6, %v2008_v43, %v2103_v17  ;;  %v2078_v56 = vunpack.i.l.bf16 %v2752_v27  ;;  %v2083_v11 = vunpack.i.l.bf16 %v2740_v20 }
 0x192   : > { %1921 = vmatprep.subr.bf16.mxu1 %v2451_v3  ;;  %v649_v5 = vsel %vm645_vm6, %v2009_v16, %v2064_v14  ;;  %v601_v24 = vsel %vm599_vm4, %v2093_v50, %v2094_v41  ;;  %v602_v28 = vsel %vm599_vm4, %v2094_v41, %v2053_v42  ;;  %v2104_v27 = vunpack.i.h.bf16 %v2776_v45 }
 0x193   : > { %v2255_v48 = vpack.i.bf16 %v649_v5, %v646_v22  ;;  %v2260_v14 = vpack.i.bf16 %v602_v28, %v601_v24  ;;  %v2215_v61 = vpack.i.bf16 %v2039_v40, %v2078_v56  ;;  %v624_v32 = vsel %vm622_vm5, %v2098_v53, %v2099_v58 }
 0x194   : > { %2246 = vrot.lane.b32.xlu1 %v2245_v13, %s2462_s30  ;;  %v2220_v36 = vpack.i.bf16 %v2044_v51, %v2083_v11  ;;  %v2265_v20 = vpack.i.bf16 %v625_v4, %v624_v32  ;;  %v2088_v42 = vunpack.i.l.bf16 %v2764_v35  ;;  %v647_v40 = vsel %vm645_vm6, %v2103_v17, %v2104_v27 }
 0x195   : > { %2201 = vrot.lane.b32.xlu0 %v2200_v15, %s2462_s30  ;;  %v648_v45 = vsel %vm645_vm6, %v2104_v27, %v2063_v21  ;;  %v3238_v51 = vunpack.i.l.bf16 %v2788_v9  ;;  %v666_v1 = vsel %vm664_vm7, %v2109_v60, %v2068_v39  ;;  %v2129_v10 = vunpack.i.h.bf16 %v2815_v52  ;;  %v2142_v21 = vpop.permute.xlu0 %2141  ;;  %v738_v52 = vld [vmem:[%s3227_s4 + $0x8] sm:$0xff]  ;;  %v739_v39 = vld [vmem:[%s3228_s5] sm:$0xff] }
 0x196   : > { %v2270_v2 = vpack.i.bf16 %v648_v45, %v647_v40  ;;  %v2305_v30 = vpack.i.bf16 %v2049_v18, %v2088_v42  ;;  %v3239_v59 = vunpack.i.l.bf16 %v2786_v8  ;;  %v683_v18 = vsel %vm681_vm8, %v2124_v63, %v2073_v6  ;;  %1781 = vmatprep.mubr.msk.f32.mxu1 %vm998_vm13, %v738_v52  ;;  %1780 = vmatprep.mubr.msk.f32.mxu0 %vm998_vm13, %v738_v52 }
 0x197   : > { %v665_v50 = vsel %vm664_vm7, %v3238_v51, %v2109_v60  ;;  %v2139_v0 = vunpack.i.h.bf16 %v2802_v29  ;;  %v699_v37 = vsel %vm698_vm9, %v2128_v26, %v2129_v10  ;;  %v700_v25 = vsel %vm698_vm9, %v2129_v10, %v2078_v56 }
 0x198   : > { %2251 = vrot.lane.b32.xlu1 %v2250_v57, %s2462_s30  ;;  %v2275_v38 = vpack.i.bf16 %v666_v1, %v665_v50  ;;  %v682_v62 = vsel %vm681_vm8, %v3239_v59, %v2124_v63  ;;  %v2285_v53 = vpack.i.bf16 %v700_v25, %v699_v37  ;;  %v2144_v8 = vunpack.i.h.bf16 %v2142_v21 }
 0x199   : > { %2206 = vrot.lane.b32.xlu0 %v2205_v19, %s2462_s30  ;;  %v2280_v9 = vpack.i.bf16 %v683_v18, %v682_v62  ;;  %v2143_v33 = vunpack.i.l.bf16 %v2142_v21  ;;  %v716_v23 = vsel %vm715_vm10, %v2138_v31, %v2139_v0  ;;  %v717_v55 = vsel %vm715_vm10, %v2139_v0, %v2083_v11 }
 0x19a   : > { %v2290_v7 = vpack.i.bf16 %v717_v55, %v716_v23  ;;  %v734_v49 = vsel %vm732_vm11, %v2144_v8, %v2088_v42  ;;  %v2463_v31 = vmov 0   ;;  %v3240_v13 = vunpack.i.h.bf16 %v2764_v35 }
 0x19b   : > { %v733_v26 = vsel %vm732_vm11, %v2143_v33, %v2144_v8  ;;  %2441 = vset.pattern.permute.xlu0 %v2463_v31  ;;  %2310 = vset.pattern.permute.xlu1 %v2463_v31 }
 0x19c   : > { %2256 = vrot.lane.b32.xlu1 %v2255_v48, %s2462_s30  ;;  %v2295_v29 = vpack.i.bf16 %v734_v49, %v733_v26  ;;  %v2300_v15 = vpack.i.bf16 %v3240_v13, %v2143_v33 }
 0x19d   : > { %2211 = vrot.lane.b32.xlu0 %v2210_v12, %s2462_s30 }
 0x1a0   : > { %2261 = vrot.lane.b32.xlu1 %v2260_v14, %s2462_s30 }
 0x1a1   : > { %2216 = vrot.lane.b32.xlu0 %v2215_v61, %s2462_s30 }
 0x1a4   : > { %2266 = vrot.lane.b32.xlu1 %v2265_v20, %s2462_s30 }
 0x1a5   : > { %2221 = vrot.lane.b32.xlu0 %v2220_v36, %s2462_s30 }
 0x1a8   : > { %2271 = vrot.lane.b32.xlu1 %v2270_v2, %s2462_s30 }
 0x1a9   : > { %2306 = vrot.lane.b32.xlu0 %v2305_v30, %s2462_s30 }
 0x1ac   : > { %2276 = vrot.lane.b32.xlu1 %v2275_v38, %s2462_s30 }
 0x1b0   : > { %2281 = vrot.lane.b32.xlu1 %v2280_v9, %s2462_s30 }
 0x1b4   : > { %2286 = vrot.lane.b32.xlu1 %v2285_v53, %s2462_s30 }
 0x1b8   : > { %2291 = vrot.lane.b32.xlu1 %v2290_v7, %s2462_s30 }
 0x1bc   : > { %2296 = vrot.lane.b32.xlu1 %v2295_v29, %s2462_s30 }
 0x1c0   : > { %2301 = vrot.lane.b32.xlu1 %v2300_v15, %s2462_s30 }
 0x1c4   : > { %742 = vperm.xlu1 %2310, %v739_v39  }
 0x1df   : > { %v2147_v17 = vpop.permute.xlu0 %2146 }
 0x1e0   : > { %v2149_v28 = vunpack.i.h.bf16 %v2147_v17  ;;  %v2148_v11 = vunpack.i.l.bf16 %v2147_v17 }
 0x1e2   : > { %v900_v2 = vsel %vm889_vm12, %v2148_v11, %v2149_v28 }
 0x1e3   : > { %v2152_v34 = vpop.permute.xlu0 %2151 }
 0x1e4   : > { %v2154_v14 = vunpack.i.h.bf16 %v2152_v34  ;;  %v2153_v61 = vunpack.i.l.bf16 %v2152_v34 }
 0x1e6   : > { %v906_v30 = vsel %vm889_vm12, %v2153_v61, %v2154_v14 }
 0x1e7   : > { %v2945_v43 = vpop.permute.xlu0 %2156 }
 0x1e8   : > { %v2159_v27 = vunpack.i.h.bf16 %v2945_v43  ;;  %v2158_v32 = vunpack.i.l.bf16 %v2945_v43 }
 0x1ea   : > { %v2976_v63 = vsel %vm889_vm12, %v2158_v32, %v2159_v27 }
 0x1eb   : > { %v2947_v54 = vpop.permute.xlu0 %2161 }
 0x1ec   : > { %v2164_v4 = vunpack.i.h.bf16 %v2947_v54  ;;  %v2163_v36 = vunpack.i.l.bf16 %v2947_v54 }
 0x1ee   : > { %v2983_v51 = vsel %vm889_vm12, %v2163_v36, %v2164_v4 }
 0x1ef   : > { %v2949_v6 = vpop.permute.xlu0 %2166 }
 0x1f0   : > { %v2169_v59 = vunpack.i.h.bf16 %v2949_v6  ;;  %v2168_v53 = vunpack.i.l.bf16 %v2949_v6 }
 0x1f3   : > { %v2951_v57 = vpop.permute.xlu0 %2171 }
 0x1f6   : > { %v2953_v16 = vpop.permute.xlu1 %2226 }
 0x1f7   : > { %v2955_v35 = vpop.permute.xlu0 %2176 }
 0x1fa   : > { %v2957_v19 = vpop.permute.xlu1 %2231 }
 0x1fb   : > { %v2959_v41 = vpop.permute.xlu0 %2181 }
 0x1fe   : > { %v2961_v22 = vpop.permute.xlu1 %2236 }
 0x1ff   : > { %v2192_v5 = vpop.permute.xlu0 %2191 }
 0x200   : > { %v2194_v42 = vunpack.i.h.bf16 %v2192_v5  ;;  %v2193_v50 = vunpack.i.l.bf16 %v2192_v5 }
 0x202   : > { %v2963_v12 = vpop.permute.xlu1 %2241  ;;  %v901_v62 = vsel %vm889_vm12, %v2149_v28, %v2194_v42  ;;  %v3006_v28 = vsel %vm889_vm12, %v2168_v53, %v2169_v59 }
 0x203   : > { %v2197_v48 = vpop.permute.xlu0 %2196 }
 0x204   : > { %v2199_v18 = vunpack.i.h.bf16 %v2197_v48  ;;  %v2198_v7 = vunpack.i.l.bf16 %v2197_v48 }
 0x206   : > { %v2247_v56 = vpop.permute.xlu1 %2246  ;;  %v907_v29 = vsel %vm889_vm12, %v2154_v14, %v2199_v18 }
 0x207   : > { %v2965_v24 = vpop.permute.xlu0 %2201  ;;  %v2249_v60 = vunpack.i.h.bf16 %v2247_v56  ;;  %v2248_v1 = vunpack.i.l.bf16 %v2247_v56 }
 0x208   : > { %v2204_v31 = vunpack.i.h.bf16 %v2965_v24 }
 0x209   : > { %v899_v0 = vsel %vm889_vm12, %v2249_v60, %v2148_v11  ;;  %v2203_v11 = vunpack.i.l.bf16 %v2965_v24  ;;  %v2229_v60 = vunpack.i.h.bf16 %v2953_v16 }
 0x20a   : > { %v2252_v58 = vpop.permute.xlu1 %2251 }
 0x20b   : > { %v2971_v40 = vpop.permute.xlu0 %2206  ;;  %v2254_v9 = vunpack.i.h.bf16 %v2252_v58  ;;  %v2253_v52 = vunpack.i.l.bf16 %v2252_v58 }
 0x20d   : > { %v905_v13 = vsel %vm889_vm12, %v2254_v9, %v2153_v61  ;;  %v2228_v9 = vunpack.i.l.bf16 %v2953_v16 }
 0x20e   : > { %v2257_v20 = vpop.permute.xlu1 %2256 }
 0x20f   : > { %v2259_v15 = vunpack.i.h.bf16 %v2257_v20  ;;  %v2995_v39 = vpop.permute.xlu0 %2211  ;;  %v2258_v14 = vunpack.i.l.bf16 %v2257_v20  ;;  %v2173_v20 = vunpack.i.l.bf16 %v2951_v57 }
 0x212   : > { %v2262_v45 = vpop.permute.xlu1 %2261 }
 0x213   : > { %v2264_v38 = vunpack.i.h.bf16 %v2262_v45  ;;  %v2263_v10 = vunpack.i.l.bf16 %v2262_v45  ;;  %v913_v45 = vsel %vm889_vm12, %v2159_v27, %v2204_v31  ;;  %v2217_v27 = vpop.permute.xlu0 %2216  ;;  %v2239_v31 = vunpack.i.h.bf16 %v2961_v22 }
 0x215   : > { %v898_v37 = vsel %vm889_vm12, %v2264_v38, %v2193_v50  ;;  %v896_v25 = vsel %vm889_vm12, %v2248_v1, %v2263_v10  ;;  %v897_v21 = vsel %vm889_vm12, %v2263_v10, %v2264_v38  ;;  %v2174_v50 = vunpack.i.h.bf16 %v2951_v57 }
 0x216   : > { %v1922_v8 = vpack.c.bf16 %v901_v62, %v898_v37  ;;  %v1888_v33 = vpack.c.bf16 %v899_v0, %v896_v25  ;;  %v2267_v23 = vpop.permute.xlu1 %2266  ;;  %v1886_v55 = vpack.c.bf16 %v900_v2, %v897_v21  ;;  %v2209_v2 = vunpack.i.h.bf16 %v2971_v40 }
 0x217   : > { %v2269_v26 = vunpack.i.h.bf16 %v2267_v23  ;;  %v2268_v49 = vunpack.i.l.bf16 %v2267_v23  ;;  %v2208_v0 = vunpack.i.l.bf16 %v2971_v40  ;;  %v917_v21 = vsel %vm889_vm12, %v2229_v60, %v2163_v36 }
 0x218   : > { %1887 = vmatprep.subr.bf16.mxu0 %v1886_v55  ;;  %1923 = vmatpush1.bf16.msra.mxu1 %v1922_v8  ;;  %v2234_v8 = vunpack.i.h.bf16 %v2957_v19  ;;  %v919_v57 = vsel %vm889_vm12, %v2164_v4, %v2209_v2  ;;  %v930_v4 = vsel %vm889_vm12, %v2173_v20, %v2174_v50 }
 0x219   : > { %v904_v17 = vsel %vm889_vm12, %v2269_v26, %v2198_v7  ;;  %v902_v34 = vsel %vm889_vm12, %v2253_v52, %v2268_v49  ;;  %1889 = vmatpush1.bf16.msra.mxu0 %v1888_v33  ;;  %1924 = vmatprep.subr.bf16.mxu1 %v2451_v3  ;;  %v903_v43 = vsel %vm889_vm12, %v2268_v49, %v2269_v26  ;;  %v2214_v33 = vunpack.i.h.bf16 %v2995_v39 }
 0x21a   : > { %v1925_v5 = vpack.c.bf16 %v907_v29, %v904_v17  ;;  %v1892_v48 = vpack.c.bf16 %v905_v13, %v902_v34  ;;  %v2272_v56 = vpop.permute.xlu1 %2271  ;;  %v1890_v58 = vpack.c.bf16 %v906_v30, %v903_v43  ;;  %v911_v30 = vsel %vm889_vm12, %v2259_v15, %v2158_v32 }
 0x21b   : > { %v2274_v61 = vunpack.i.h.bf16 %v2272_v56  ;;  %v2273_v42 = vunpack.i.l.bf16 %v2272_v56  ;;  %v2233_v7 = vunpack.i.l.bf16 %v2957_v19  ;;  %v2213_v52 = vunpack.i.l.bf16 %v2995_v39 }
 0x21c   : > { %1891 = vmatprep.subr.bf16.mxu0 %v1890_v58  ;;  %1926 = vmatpush1.bf16.msra.mxu1 %v1925_v5  ;;  %v923_v29 = vsel %vm889_vm12, %v2234_v8, %v2168_v53  ;;  %v925_v13 = vsel %vm889_vm12, %v2169_v59, %v2214_v33  ;;  %v2219_v15 = vunpack.i.h.bf16 %v2217_v27  ;;  %v2179_v19 = vunpack.i.h.bf16 %v2955_v35 }
 0x21d   : > { %v910_v1 = vsel %vm889_vm12, %v2274_v61, %v2203_v11  ;;  %v908_v38 = vsel %vm889_vm12, %v2258_v14, %v2273_v42  ;;  %1893 = vmatpush1.bf16.msra.mxu0 %v1892_v48  ;;  %1927 = vmatprep.subr.bf16.mxu1 %v2451_v3  ;;  %v909_v24 = vsel %vm889_vm12, %v2273_v42, %v2274_v61  ;;  %v2178_v34 = vunpack.i.l.bf16 %v2955_v35 }
 0x21e   : > { %v1928_v10 = vpack.c.bf16 %v913_v45, %v910_v1  ;;  %v1896_v62 = vpack.c.bf16 %v911_v30, %v908_v38  ;;  %v2277_v18 = vpop.permute.xlu1 %2276  ;;  %v1894_v32 = vpack.c.bf16 %v2976_v63, %v909_v24  ;;  %v2238_v48 = vunpack.i.l.bf16 %v2961_v22 }
 0x21f   : > { %v2279_v37 = vunpack.i.h.bf16 %v2277_v18  ;;  %v2278_v25 = vunpack.i.l.bf16 %v2277_v18  ;;  %v2218_v56 = vunpack.i.l.bf16 %v2217_v27  ;;  %v929_v14 = vsel %vm889_vm12, %v2239_v31, %v2173_v20 }
 0x220   : > { %1895 = vmatprep.subr.bf16.mxu0 %v1894_v32  ;;  %1929 = vmatpush1.bf16.msra.mxu1 %v1928_v10  ;;  %v2244_v61 = vunpack.i.h.bf16 %v2963_v12  ;;  %v931_v42 = vsel %vm889_vm12, %v2174_v50, %v2219_v15  ;;  %v936_v24 = vsel %vm889_vm12, %v2178_v34, %v2179_v19  ;;  %v2243_v50 = vunpack.i.l.bf16 %v2963_v12  ;;  %v3081_v15 = vld [vmem:[#allocation2] sm:$0xff] }
 0x221   : > { %v916_v16 = vsel %vm889_vm12, %v2279_v37, %v2208_v0  ;;  %v914_v40 = vsel %vm889_vm12, %v2228_v9, %v2278_v25  ;;  %1897 = vmatpush1.bf16.msra.mxu0 %v1896_v62  ;;  %1930 = vmatprep.subr.bf16.mxu1 %v2451_v3  ;;  %v915_v63 = vsel %vm889_vm12, %v2278_v25, %v2279_v37  ;;  %v2184_v62 = vunpack.i.h.bf16 %v2959_v41 }
 0x222   : > { %v1931_v36 = vpack.c.bf16 %v919_v57, %v916_v16  ;;  %v1900_v23 = vpack.c.bf16 %v917_v21, %v914_v40  ;;  %v2282_v55 = vpop.permute.xlu1 %2281  ;;  %v1898_v54 = vpack.c.bf16 %v2983_v51, %v915_v63  ;;  %v2222_v51 = vpop.permute.xlu0 %2221  ;;  %v2183_v18 = vunpack.i.l.bf16 %v2959_v41 }
 0x223   : > { %v2284_v26 = vunpack.i.h.bf16 %v2282_v55  ;;  %v2283_v49 = vunpack.i.l.bf16 %v2282_v55  ;;  %v2224_v60 = vunpack.i.h.bf16 %v2222_v51  ;;  %v2223_v20 = vunpack.i.l.bf16 %v2222_v51 }
 0x224   : > { %1899 = vmatprep.subr.bf16.mxu0 %v1898_v54  ;;  %1932 = vmatpush1.bf16.msra.mxu1 %v1931_v36  ;;  %v935_v32 = vsel %vm889_vm12, %v2244_v61, %v2178_v34  ;;  %v942_v63 = vsel %vm889_vm12, %v2183_v18, %v2184_v62  ;;  %v1153_v51 = vlaneseq }
 0x225   : > { %v922_v39 = vsel %vm889_vm12, %v2284_v26, %v2213_v52  ;;  %v920_v17 = vsel %vm889_vm12, %v2233_v7, %v2283_v49  ;;  %1901 = vmatpush1.bf16.msra.mxu0 %v1900_v23  ;;  %1933 = vmatprep.subr.bf16.mxu1 %v2451_v3  ;;  %v921_v53 = vsel %vm889_vm12, %v2283_v49, %v2284_v26  ;;  %v737_v49 = vld [vmem:[%s3227_s4] sm:$0xff] }
 0x226   : > { %v1934_v6 = vpack.c.bf16 %v925_v13, %v922_v39  ;;  %v1904_v43 = vpack.c.bf16 %v923_v29, %v920_v17  ;;  %v2287_v59 = vpop.permute.xlu1 %2286  ;;  %v1902_v5 = vpack.c.bf16 %v3006_v28, %v921_v53  ;;  %v2307_v28 = vpop.permute.xlu0 %2306  ;;  %v937_v9 = vsel %vm889_vm12, %v2179_v19, %v2224_v60  ;;  %v566_v53 = vld [vmem:[%s3226_s3] sm:$0x7] }
 0x227   : > { %v2289_v58 = vunpack.i.h.bf16 %v2287_v59  ;;  %v2288_v11 = vunpack.i.l.bf16 %v2287_v59  ;;  %v2309_v0 = vunpack.i.h.bf16 %v2307_v28  ;;  %v2308_v33 = vunpack.i.l.bf16 %v2307_v28 }
 0x228   : > { %1903 = vmatprep.subr.bf16.mxu0 %v1902_v5  ;;  %1935 = vmatpush1.bf16.msra.mxu1 %v1934_v6  ;;  %v1154_v19 = vshrl.u32 %v1153_v51, 7 }
 0x229   : > { %v928_v35 = vsel %vm889_vm12, %v2289_v58, %v2218_v56  ;;  %v926_v45 = vsel %vm889_vm12, %v2238_v48, %v2288_v11  ;;  %1905 = vmatpush1.bf16.msra.mxu0 %v1904_v43  ;;  %1936 = vmatprep.subr.bf16.mxu1 %v2451_v3  ;;  %v927_v22 = vsel %vm889_vm12, %v2288_v11, %v2289_v58 }
 0x22a   : > { %v1937_v2 = vpack.c.bf16 %v931_v42, %v928_v35  ;;  %v1908_v30 = vpack.c.bf16 %v929_v14, %v926_v45  ;;  %v2292_v1 = vpop.permute.xlu1 %2291  ;;  %v1906_v38 = vpack.c.bf16 %v930_v4, %v927_v22  ;;  %v943_v36 = vsel %vm889_vm12, %v2184_v62, %v2309_v0 }
 0x22b   : > { %v2294_v27 = vunpack.i.h.bf16 %v2292_v1  ;;  %v2293_v10 = vunpack.i.l.bf16 %v2292_v1  ;;  %v1163_v17 = vsub.s32 2, %v1154_v19  ;;  %v1155_v5 = vsub.s32 0, %v1154_v19 }
 0x22c   : > { %1907 = vmatprep.subr.bf16.mxu0 %v1906_v38  ;;  %1938 = vmatpush1.bf16.msra.mxu1 %v1937_v2  ;;  %v1159_v56 = vsub.s32 1, %v1154_v19 }
 0x22d   : > { %v934_v37 = vsel %vm889_vm12, %v2294_v27, %v2223_v20  ;;  %v932_v25 = vsel %vm889_vm12, %v2243_v50, %v2293_v10  ;;  %1909 = vmatpush1.bf16.msra.mxu0 %v1908_v30  ;;  %1939 = vmatprep.subr.bf16.mxu1 %v2451_v3  ;;  %v933_v12 = vsel %vm889_vm12, %v2293_v10, %v2294_v27 }
 0x22e   : > { %v1940_v21 = vpack.c.bf16 %v937_v9, %v934_v37  ;;  %v1912_v8 = vpack.c.bf16 %v935_v32, %v932_v25  ;;  %v2297_v57 = vpop.permute.xlu1 %2296  ;;  %v1910_v41 = vpack.c.bf16 %v936_v24, %v933_v12  ;;  %v1164_v59 = vrot.slane %v566_v53, %v1163_v17 }
 0x22f   : > { %v2299_v16 = vunpack.i.h.bf16 %v2297_v57  ;;  %v2298_v40 = vunpack.i.l.bf16 %v2297_v57  ;;  %v1156_v60 = vrot.slane %v566_v53, %v1155_v5  ;;  %v1160_v22 = vrot.slane %v566_v53, %v1159_v56 }
 0x230   : > { %1911 = vmatprep.subr.bf16.mxu0 %v1910_v41  ;;  %1941 = vmatpush1.bf16.msra.mxu1 %v1940_v21 }
 0x231   : > { %v940_v23 = vsel %vm889_vm12, %v2299_v16, %v2308_v33  ;;  %1913 = vmatpush1.bf16.msra.mxu0 %v1912_v8  ;;  %1942 = vmatprep.subr.bf16.mxu1 %v2451_v3  ;;  %v939_v55 = vsel %vm889_vm12, %v2298_v40, %v2299_v16 }
 0x232   : > { %v1943_v54 = vpack.c.bf16 %v943_v36, %v940_v23  ;;  %v2302_v4 = vpop.permute.xlu1 %2301  ;;  %v1914_v7 = vpack.c.bf16 %v942_v63, %v939_v55 }
 0x233   : > { %v2304_v52 = vunpack.i.h.bf16 %v2302_v4  ;;  %v2303_v26 = vunpack.i.l.bf16 %v2302_v4 }
 0x234   : > { %1915 = vmatprep.subr.bf16.mxu0 %v1914_v7  ;;  %1944 = vmatpush1.bf16.msra.mxu1 %v1943_v54 }
 0x235   : > { %v941_v29 = vsel %vm889_vm12, %v2304_v52, %v2183_v18  ;;  %v938_v31 = vsel %vm889_vm12, %v2303_v26, %v2298_v40  ;;  %1961 = vmatprep.subr.bf16.mxu1 %v2451_v3 }
 0x236   : > { %v1916_v13 = vpack.c.bf16 %v941_v29, %v938_v31 }
 0x237   : > { %1138 = vmatmul.mubr.f32.vlgmr.msra.gmra.mrb[2].mxu1 %v737_v49 }
 0x238   : > { %1917 = vmatpush1.bf16.msra.mxu0 %v1916_v13  ;;  %1846 = vmatprep.mubr.msk.f32.mxu1 %vm2452_vm0, %v3081_v15 }
 0x23b   : > { %1067 = vmatmul.mubr.f32.vlgmr.msra.gmra.mrb[2].mxu0 %v737_v49 }
 0x23c   : > { %1456 = vmatprep.mubr.f32.mxu0 %v3081_v15 }
 0x243   : > { %v743_v39 = vpop.permute.xlu1 %742 }
 0x30a   : > { %v1139_v34 = vpop.f32.mrb[2].mxu1 }
 0x30b   : > { %v1140_v6 = vadd.f32 %v1139_v34, %v743_v39  ;;  %v1141_v43 = vpop.f32.mrb[3].mxu1 }
 0x30d   : > { %vm1145_vm14 = vcmp.gt.f32.partialorder %v1140_v6, 0.0  ;;  %v1148_v48 = vmul.f32 0.01, %v1140_v6 }
 0x30e   : > { %v1068_v58 = vpop.f32.mrb[2].mxu0 }
 0x30f   : > { %v1151_v11 = vsel %vm1145_vm14, %v1140_v6, %v1148_v48  ;;  %v1069_v14 = vadd.f32 %v1068_v58, %v743_v39  ;;  %v1070_v61 = vpop.f32.mrb[3].mxu0 }
 0x310   : > { %v1170_v42 = vmul.f32 %v1164_v59, %v1151_v11  ;;  %v1071_v35 = vadd.f32 %v1070_v61, %v743_v39 }
 0x311   : > { %vm1143_vm15 = vcmp.gt.f32.partialorder %v1069_v14, 0.0  ;;  %v1146_v45 = vmul.f32 0.01, %v1069_v14 }
 0x312   : > { %1173 = vst.msk [vmem:[#allocation2 + $0x18] sm:$0xff] %vm558_vm2, %v1170_v42  ;;  %vm1144_vm1 = vcmp.gt.f32.partialorder %v1071_v35, 0.0  ;;  %v1147_v28 = vmul.f32 0.01, %v1071_v35 }
 0x313   : > { %v1149_v2 = vsel %vm1143_vm15, %v1069_v14, %v1146_v45 }
 0x314   : > { %v1168_v30 = vmul.f32 %v1156_v60, %v1149_v2  ;;  %v1150_v1 = vsel %vm1144_vm1, %v1071_v35, %v1147_v28 }
 0x315   : > { %v1169_v38 = vmul.f32 %v1160_v22, %v1150_v1 }
 0x317   : > { %v2326_v24 = vpack.i.bf16 %v1169_v38, %v1168_v30 }
 0x319   : > { %v1177_v50 = vld [vmem:[#allocation2 + $0x18] sm:$0xff]  ;;  %2327 = vrot.lane.b32.xlu0 %v2326_v24, %s2454_s18 }
 0x31a   : > { %v2311_v20 = vpack.i.bf16 %v3081_v15, %v1177_v50 }
 0x31c   : > { %2312 = vrot.lane.b32.xlu1 %v2311_v20, %s2454_s18 }
 0x31d   : > { %2332 = vrot.lane.b32.xlu0 %v2326_v24, %s2455_s11 }
 0x320   : > { %2317 = vrot.lane.b32.xlu1 %v2311_v20, %s2455_s11 }
 0x321   : > { %2337 = vrot.lane.b32.xlu0 %v2326_v24, %s2456_s24 }
 0x324   : > { %2322 = vrot.lane.b32.xlu1 %v2311_v20, %s2456_s24 }
 0x325   : > { %2342 = vrot.lane.b32.xlu0 %v2326_v24, %s2457_s23 }
 0x328   : > { %1219 = vrot.lane.b32.xlu1 %v1177_v50, %s2457_s23 }
 0x329   : > { %2347 = vrot.lane.b32.xlu0 %v2326_v24, %s2459_s26 }
 0x32c   : > { %1227 = vrot.lane.b32.xlu1 %v1177_v50, %s2459_s26 }
 0x32d   : > { %2352 = vrot.lane.b32.xlu0 %v2326_v24, %s2458_s25 }
 0x330   : > { %1235 = vrot.lane.b32.xlu1 %v1177_v50, %s2458_s25 }
 0x331   : > { %2357 = vrot.lane.b32.xlu0 %v2326_v24, %s2461_s29 }
 0x334   : > { %1243 = vrot.lane.b32.xlu1 %v1177_v50, %s2461_s29 }
 0x335   : > { %1247 = vrot.lane.b32.xlu0 %v1168_v30, %s2460_s28 }
 0x338   : > { %1249 = vrot.lane.b32.xlu1 %v1169_v38, %s2460_s28 }
 0x339   : > { %1251 = vrot.lane.b32.xlu0 %v1177_v50, %s2460_s28 }
 0x33c   : > { %2362 = vrot.lane.b32.xlu1 %v2326_v24, %s2462_s30 }
 0x38b   : > { %v2328_v27 = vpop.permute.xlu0 %2327 }
 0x38c   : > { %v2329_v26 = vunpack.i.l.bf16 %v2328_v27  ;;  %v2330_v49 = vunpack.i.h.bf16 %v2328_v27 }
 0x38e   : > { %v2313_v10 = vpop.permute.xlu1 %2312  ;;  %v1191_v6 = vsel %vm599_vm4, %v2329_v26, %v2330_v49 }
 0x38f   : > { %v2314_v62 = vunpack.i.l.bf16 %v2313_v10  ;;  %v2333_v18 = vpop.permute.xlu0 %2332  ;;  %v2315_v54 = vunpack.i.h.bf16 %v2313_v10 }
 0x390   : > { %v2334_v59 = vunpack.i.l.bf16 %v2333_v18  ;;  %v2335_v11 = vunpack.i.h.bf16 %v2333_v18 }
 0x391   : > { %v2366_v32 = vpack.i.bf16 %v2314_v62, %v1177_v50  ;;  %v1190_v19 = vsel %vm599_vm4, %v2315_v54, %v2329_v26  ;;  %v1192_v39 = vsel %vm599_vm4, %v2330_v49, %v2314_v62  ;;  %vm1549_vm4 = vcmask 64512  }
 0x392   : > { %v2318_v9 = vpop.permute.xlu1 %2317  ;;  %v2396_v43 = vpack.i.bf16 %v1190_v19, %v3081_v15  ;;  %v2406_v5 = vpack.i.bf16 %v1192_v39, %v1191_v6  ;;  %v1202_v30 = vsel %vm622_vm5, %v2334_v59, %v2335_v11 }
 0x393   : > { %2367 = vrot.lane.b32.xlu0 %v2366_v32, %s2462_s30  ;;  %v2338_v0 = vpop.permute.xlu0 %2337  ;;  %v2319_v25 = vunpack.i.l.bf16 %v2318_v9  ;;  %v2320_v17 = vunpack.i.h.bf16 %v2318_v9 }
 0x394   : > { %v2339_v53 = vunpack.i.l.bf16 %v2338_v0  ;;  %v2340_v34 = vunpack.i.h.bf16 %v2338_v0 }
 0x395   : > { %v1201_v14 = vsel %vm622_vm5, %v2320_v17, %v2334_v59  ;;  %v1203_v45 = vsel %vm622_vm5, %v2335_v11, %v2319_v25 }
 0x396   : > { %v2323_v37 = vpop.permute.xlu1 %2322  ;;  %v1213_v61 = vsel %vm645_vm6, %v2339_v53, %v2340_v34  ;;  %v2411_v1 = vpack.i.bf16 %v1203_v45, %v1202_v30 }
 0x397   : > { %v2324_v12 = vunpack.i.l.bf16 %v2323_v37  ;;  %v2343_v21 = vpop.permute.xlu0 %2342  ;;  %v2325_v13 = vunpack.i.h.bf16 %v2323_v37 }
 0x398   : > { %v2344_v33 = vunpack.i.l.bf16 %v2343_v21  ;;  %v2345_v60 = vunpack.i.h.bf16 %v2343_v21 }
 0x399   : > { %v2371_v8 = vpack.i.bf16 %v2324_v12, %v2319_v25  ;;  %v1212_v48 = vsel %vm645_vm6, %v2325_v13, %v2339_v53  ;;  %v1214_v58 = vsel %vm645_vm6, %v2340_v34, %v2324_v12 }
 0x39a   : > { %v1220_v57 = vpop.permute.xlu1 %1219  ;;  %v2401_v42 = vpack.i.bf16 %v1212_v48, %v1201_v14  ;;  %v2416_v35 = vpack.i.bf16 %v1214_v58, %v1213_v61  ;;  %v1221_v20 = vsel %vm664_vm7, %v2344_v33, %v2345_v60 }
 0x39b   : > { %2372 = vrot.lane.b32.xlu0 %v2371_v8, %s2462_s30  ;;  %v2348_v41 = vpop.permute.xlu0 %2347  ;;  %v1222_v27 = vsel %vm664_vm7, %v2345_v60, %v1220_v57 }
 0x39c   : > { %v2349_v16 = vunpack.i.l.bf16 %v2348_v41  ;;  %v2350_v56 = vunpack.i.h.bf16 %v2348_v41  ;;  %v2421_v18 = vpack.i.bf16 %v1222_v27, %v1221_v20  ;;  %v1543_v41 = vld [vmem:[%s3232_s9] sm:$0xff] }
 0x39e   : > { %v1228_v40 = vpop.permute.xlu1 %1227  ;;  %v2386_v63 = vpack.i.bf16 %v2349_v16, %v2344_v33  ;;  %v1229_v28 = vsel %vm681_vm8, %v2349_v16, %v2350_v56 }
 0x39f   : > { %v2376_v36 = vpack.i.bf16 %v1228_v40, %v1220_v57  ;;  %v2353_v23 = vpop.permute.xlu0 %2352  ;;  %v1230_v2 = vsel %vm681_vm8, %v2350_v56, %v1228_v40  ;;  %v1256_v57 = vld [vmem:[%s3230_s7] sm:$0xff] }
 0x3a0   : > { %2387 = vrot.lane.b32.xlu1 %v2386_v63, %s2462_s30  ;;  %v2354_v7 = vunpack.i.l.bf16 %v2353_v23  ;;  %v2355_v38 = vunpack.i.h.bf16 %v2353_v23  ;;  %v2426_v50 = vpack.i.bf16 %v1230_v2, %v1229_v28 }
 0x3a1   : > { %2377 = vrot.lane.b32.xlu0 %v2376_v36, %s2462_s30 }
 0x3a2   : > { %v1236_v55 = vpop.permute.xlu1 %1235  ;;  %v1237_v9 = vsel %vm698_vm9, %v2354_v7, %v2355_v38 }
 0x3a3   : > { %v2358_v4 = vpop.permute.xlu0 %2357  ;;  %v1238_v0 = vsel %vm698_vm9, %v2355_v38, %v1236_v55 }
 0x3a4   : > { %v2359_v52 = vunpack.i.l.bf16 %v2358_v4  ;;  %v2360_v22 = vunpack.i.h.bf16 %v2358_v4  ;;  %v2431_v12 = vpack.i.bf16 %v1238_v0, %v1237_v9 }
 0x3a6   : > { %v1244_v29 = vpop.permute.xlu1 %1243  ;;  %v2391_v31 = vpack.i.bf16 %v2359_v52, %v2354_v7  ;;  %v1245_v10 = vsel %vm715_vm10, %v2359_v52, %v2360_v22 }
 0x3a7   : > { %v2381_v51 = vpack.i.bf16 %v1244_v29, %v1236_v55  ;;  %v1248_v24 = vpop.permute.xlu0 %1247  ;;  %v1246_v62 = vsel %vm715_vm10, %v2360_v22, %v1244_v29 }
 0x3a8   : > { %2392 = vrot.lane.b32.xlu1 %v2391_v31, %s2462_s30  ;;  %v2436_v32 = vpack.i.bf16 %v1246_v62, %v1245_v10 }
 0x3a9   : > { %2382 = vrot.lane.b32.xlu0 %v2381_v51, %s2462_s30 }
 0x3aa   : > { %v1250_v37 = vpop.permute.xlu1 %1249 }
 0x3ab   : > { %v1252_v25 = vpop.permute.xlu0 %1251  ;;  %v1253_v8 = vsel %vm732_vm11, %v1248_v24, %v1250_v37 }
 0x3ac   : > { %2397 = vrot.lane.b32.xlu1 %v2396_v43, %s2462_s30  ;;  %v1254_v21 = vsel %vm732_vm11, %v1250_v37, %v1252_v25 }
 0x3ad   : > { %2407 = vrot.lane.b32.xlu0 %v2406_v5, %s2462_s30 }
 0x3ae   : > { %v2363_v16 = vpop.permute.xlu1 %2362 }
 0x3af   : > { %v2365_v54 = vunpack.i.h.bf16 %v2363_v16  ;;  %v2364_v4 = vunpack.i.l.bf16 %v2363_v16 }
 0x3b0   : > { %2402 = vrot.lane.b32.xlu1 %v2401_v42, %s2462_s30 }
 0x3b1   : > { %2417 = vrot.lane.b32.xlu0 %v2416_v35, %s2462_s30  ;;  %v1335_v19 = vsel %vm889_vm12, %v2364_v4, %v2365_v54 }
 0x3b4   : > { %2412 = vrot.lane.b32.xlu1 %v2411_v1, %s2462_s30 }
 0x3b5   : > { %2427 = vrot.lane.b32.xlu0 %v2426_v50, %s2462_s30 }
 0x3b8   : > { %2422 = vrot.lane.b32.xlu1 %v2421_v18, %s2462_s30 }
 0x3b9   : > { %2437 = vrot.lane.b32.xlu0 %v2436_v32, %s2462_s30 }
 0x3bc   : > { %2432 = vrot.lane.b32.xlu1 %v2431_v12, %s2462_s30 }
 0x3bd   : > { %1330 = vrot.lane.b32.xlu0 %v1254_v21, %s2462_s30 }
 0x3c0   : > { %1328 = vrot.lane.b32.xlu1 %v1253_v8, %s2462_s30 }
 0x3c1   : > { %1332 = vrot.lane.b32.xlu0 %v1252_v25, %s2462_s30 }
 0x3c4   : > { %1326 = vrot.lane.b32.xlu1 %v1248_v24, %s2462_s30 }
 0x3c5   : > { %1546 = vperm.xlu0 %2441, %v1543_v41  }
 0x3c8   : > { %1259 = vperm.xlu1 %2310, %v1256_v57  }
 0x405   : > { %v2368_v33 = vpop.permute.xlu0 %2367 }
 0x406   : > { %v2369_v7 = vunpack.i.l.bf16 %v2368_v33  ;;  %v2370_v31 = vunpack.i.h.bf16 %v2368_v33 }
 0x408   : > { %v1336_v17 = vsel %vm889_vm12, %v2365_v54, %v2369_v7 }
 0x40d   : > { %v2373_v40 = vpop.permute.xlu0 %2372 }
 0x40e   : > { %v2375_v61 = vunpack.i.h.bf16 %v2373_v40  ;;  %v2374_v42 = vunpack.i.l.bf16 %v2373_v40 }
 0x412   : > { %v3154_v63 = vpop.permute.xlu1 %2387 }
 0x413   : > { %v3156_v36 = vpop.permute.xlu0 %2377  ;;  %v2390_v60 = vunpack.i.h.bf16 %v3154_v63  ;;  %v2389_v45 = vunpack.i.l.bf16 %v3154_v63 }
 0x414   : > { %v2380_v1 = vunpack.i.h.bf16 %v3156_v36  ;;  %v2379_v18 = vunpack.i.l.bf16 %v3156_v36 }
 0x41a   : > { %v3158_v23 = vpop.permute.xlu1 %2392 }
 0x41b   : > { %v3160_v55 = vpop.permute.xlu0 %2382  ;;  %v2395_v25 = vunpack.i.h.bf16 %v3158_v23  ;;  %v2394_v63 = vunpack.i.l.bf16 %v3158_v23 }
 0x41c   : > { %v2385_v7 = vunpack.i.h.bf16 %v3160_v55 }
 0x41e   : > { %v2398_v52 = vpop.permute.xlu1 %2397 }
 0x41f   : > { %v2408_v26 = vpop.permute.xlu0 %2407  ;;  %v2400_v49 = vunpack.i.h.bf16 %v2398_v52  ;;  %v2399_v29 = vunpack.i.l.bf16 %v2398_v52 }
 0x420   : > { %v2410_v13 = vunpack.i.h.bf16 %v2408_v26  ;;  %v2409_v51 = vunpack.i.l.bf16 %v2408_v26 }
 0x421   : > { %v1334_v39 = vsel %vm889_vm12, %v2399_v29, %v2364_v4 }
 0x422   : > { %v1339_v53 = vsel %vm889_vm12, %v2410_v13, %v2370_v31  ;;  %v1338_v34 = vsel %vm889_vm12, %v2409_v51, %v2410_v13  ;;  %v1337_v6 = vsel %vm889_vm12, %v2400_v49, %v2409_v51  ;;  %v2403_v43 = vpop.permute.xlu1 %2402  ;;  %v2384_v31 = vunpack.i.l.bf16 %v3160_v55 }
 0x423   : > { %v1962_v59 = vpack.c.bf16 %v1339_v53, %v1336_v17  ;;  %v2418_v5 = vpop.permute.xlu0 %2417  ;;  %v1945_v48 = vpack.c.bf16 %v1338_v34, %v1335_v19  ;;  %v1947_v56 = vpack.c.bf16 %v1337_v6, %v1334_v39  ;;  %v2405_v14 = vunpack.i.h.bf16 %v2403_v43 }
 0x424   : > { %v2420_v58 = vunpack.i.h.bf16 %v2418_v5  ;;  %v2419_v11 = vunpack.i.l.bf16 %v2418_v5  ;;  %v2404_v28 = vunpack.i.l.bf16 %v2403_v43 }
 0x425   : > { %1946 = vmatprep.subr.bf16.mxu0 %v1945_v48  ;;  %1963 = vmatpush3.bf16.msra.mxu1 %v1962_v59 }
 0x426   : > { %1948 = vmatpush1.bf16.msra.mxu0 %v1947_v56  ;;  %v2413_v35 = vpop.permute.xlu1 %2412  ;;  %1964 = vmatprep.subr.bf16.mxu1 %v2451_v3  ;;  %v1345_v38 = vsel %vm889_vm12, %v2420_v58, %v2375_v61  ;;  %v1343_v20 = vsel %vm889_vm12, %v2405_v14, %v2419_v11  ;;  %v1344_v37 = vsel %vm889_vm12, %v2419_v11, %v2420_v58 }
 0x427   : > { %v2428_v22 = vpop.permute.xlu0 %2427  ;;  %v2415_v2 = vunpack.i.h.bf16 %v2413_v35  ;;  %v2414_v30 = vunpack.i.l.bf16 %v2413_v35 }
 0x428   : > { %v2430_v24 = vunpack.i.h.bf16 %v2428_v22  ;;  %v2429_v50 = vunpack.i.l.bf16 %v2428_v22 }
 0x429   : > { %v1342_v27 = vsel %vm889_vm12, %v2415_v2, %v2374_v42  ;;  %v1340_v10 = vsel %vm889_vm12, %v2404_v28, %v2414_v30  ;;  %v1341_v62 = vsel %vm889_vm12, %v2414_v30, %v2415_v2  ;;  %v1542_v42 = vld [vmem:[%s3231_s8] sm:$0xff] }
 0x42a   : > { %v1965_v32 = vpack.c.bf16 %v1345_v38, %v1342_v27  ;;  %v1951_v9 = vpack.c.bf16 %v1343_v20, %v1340_v10  ;;  %v2423_v0 = vpop.permute.xlu1 %2422  ;;  %v1949_v57 = vpack.c.bf16 %v1344_v37, %v1341_v62  ;;  %v1351_v41 = vsel %vm889_vm12, %v2430_v24, %v2380_v1 }
 0x42b   : > { %v2438_v12 = vpop.permute.xlu0 %2437  ;;  %v2425_v21 = vunpack.i.h.bf16 %v2423_v0  ;;  %v2424_v8 = vunpack.i.l.bf16 %v2423_v0  ;;  %v1349_v33 = vsel %vm889_vm12, %v2390_v60, %v2429_v50  ;;  %v1350_v29 = vsel %vm889_vm12, %v2429_v50, %v2430_v24 }
 0x42c   : > { %v2440_v16 = vunpack.i.h.bf16 %v2438_v12  ;;  %v2439_v40 = vunpack.i.l.bf16 %v2438_v12  ;;  %1966 = vmatpush3.bf16.msra.mxu1 %v1965_v32  ;;  %1950 = vmatprep.subr.bf16.mxu0 %v1949_v57 }
 0x42d   : > { %v1348_v36 = vsel %vm889_vm12, %v2425_v21, %v2379_v18  ;;  %v1346_v54 = vsel %vm889_vm12, %v2389_v45, %v2424_v8  ;;  %1967 = vmatprep.subr.bf16.mxu1 %v2451_v3  ;;  %v1347_v4 = vsel %vm889_vm12, %v2424_v8, %v2425_v21  ;;  %1952 = vmatpush1.bf16.msra.mxu0 %v1951_v9 }
 0x42e   : > { %v1968_v52 = vpack.c.bf16 %v1351_v41, %v1348_v36  ;;  %v1955_v26 = vpack.c.bf16 %v1349_v33, %v1346_v54  ;;  %v2433_v49 = vpop.permute.xlu1 %2432  ;;  %v1953_v19 = vpack.c.bf16 %v1350_v29, %v1347_v4  ;;  %v1357_v39 = vsel %vm889_vm12, %v2440_v16, %v2385_v7 }
 0x42f   : > { %v1331_v23 = vpop.permute.xlu0 %1330  ;;  %v2435_v13 = vunpack.i.h.bf16 %v2433_v49  ;;  %v2434_v51 = vunpack.i.l.bf16 %v2433_v49  ;;  %v1355_v17 = vsel %vm889_vm12, %v2395_v25, %v2439_v40  ;;  %v1356_v53 = vsel %vm889_vm12, %v2439_v40, %v2440_v16 }
 0x430   : > { %1969 = vmatpush3.bf16.msra.mxu1 %v1968_v52  ;;  %1954 = vmatprep.subr.bf16.mxu0 %v1953_v19 }
 0x431   : > { %v1354_v34 = vsel %vm889_vm12, %v2435_v13, %v2384_v31  ;;  %v1352_v6 = vsel %vm889_vm12, %v2394_v63, %v2434_v51  ;;  %1970 = vmatprep.subr.bf16.mxu1 %v2451_v3  ;;  %v1353_v55 = vsel %vm889_vm12, %v2434_v51, %v2435_v13  ;;  %1956 = vmatpush1.bf16.msra.mxu0 %v1955_v26  ;;  %v1255_v3 = vld [vmem:[%s3229_s6] sm:$0xff] }
 0x432   : > { %v1971_v43 = vpack.c.bf16 %v1357_v39, %v1354_v34  ;;  %v1959_v59 = vpack.c.bf16 %v1355_v17, %v1352_v6  ;;  %v1329_v5 = vpop.permute.xlu1 %1328  ;;  %v1957_v48 = vpack.c.bf16 %v1356_v53, %v1353_v55 }
 0x433   : > { %v1333_v56 = vpop.permute.xlu0 %1332  ;;  %v1359_v11 = vsel %vm889_vm12, %v1329_v5, %v1331_v23 }
 0x434   : > { %1958 = vmatprep.subr.bf16.mxu0 %v1957_v48  ;;  %1972 = vmatpush3.bf16.msra.mxu1 %v1971_v43  ;;  %v1360_v14 = vsel %vm889_vm12, %v1331_v23, %v1333_v56 }
 0x435   : > { %1844 = vmatprep.subr.mxu1 %v3081_v15  ;;  %1960 = vmatpush1.bf16.msra.mxu0 %v1959_v59 }
 0x436   : > { %v1327_v58 = vpop.permute.xlu1 %1326  ;;  %1408 = vmatprep.subr.mxu0 %v1359_v11 }
 0x437   : > { %v1358_v61 = vsel %vm889_vm12, %v1327_v58, %v1329_v5 }
 0x438   : > { %1845 = vmatpush3.msra.mxu1 %v1360_v14 }
 0x439   : > { %1847 = vmatmul.mubr.msk.f32.vlgmr.msra.gmra.mrb[4].mxu1 %vm1388_vm3, %v1255_v3  ;;  %1849 = vmatprep.subr.mxu1 %v3081_v15 }
 0x43a   : > { %1409 = vmatpush1.msra.mxu0 %v1358_v61  ;;  %1850 = vmatpush3.msra.mxu1 %v2652_v44 }
 0x43b   : > { %1782 = vmatmul.mubr.msk.f32.vlgmr.msra.gmra.mrb[4].mxu0 %vm1388_vm3, %v1255_v3  ;;  %1553 = vmatprep.subr.mxu0 %v2658_v47 }
 0x43c   : > { %1554 = vmatpush1.msra.mxu0 %v2656_v46  ;;  %1851 = vmatprep.mubr.msk.f32.mxu1 %vm2452_vm0, %v3081_v15 }
 0x43d   : > { %1617 = vmatprep.mubr.f32.mxu0 %v3081_v15  ;;  %1852 = vmatmul.mubr.msk.f32.vlgmr.msra.gmra.mrb[6].mxu1 %vm1549_vm4, %v1542_v42 }
 0x43f   : > { %1784 = vmatmul.mubr.msk.f32.vlgmr.msra.gmra.mrb[6].mxu0 %vm1549_vm4, %v1542_v42 }
 0x444   : > { %v1547_v28 = vpop.permute.xlu0 %1546 }
 0x447   : > { %v1260_v60 = vpop.permute.xlu1 %1259 }
 0x50c   : > { %v1529_v35 = vpop.f32.mrb[4].mxu1 }
 0x50d   : > { %v1530_v44 = vadd.f32 %v1529_v35, %v1260_v60  ;;  %v1848_v45 = vpop.f32.mrb[5].mxu1 }
 0x50e   : > { %v1458_v22 = vpop.f32.mrb[4].mxu0 }
 0x50f   : > { %vm1535_vm5 = vcmp.gt.f32.partialorder %v1530_v44, 0.0  ;;  %v1538_v2 = vmul.f32 0.01, %v1530_v44  ;;  %v1459_v30 = vadd.f32 %v1458_v22, %v1260_v60  ;;  %v1460_v47 = vpop.f32.mrb[5].mxu0 }
 0x510   : > { %v1461_v1 = vadd.f32 %v1460_v47, %v1260_v60  ;;  %v1690_v46 = vpop.f32.mrb[6].mxu1 }
 0x511   : > { %vm1533_vm6 = vcmp.gt.f32.partialorder %v1459_v30, 0.0  ;;  %v1536_v38 = vmul.f32 0.01, %v1459_v30  ;;  %v1541_v24 = vsel %vm1535_vm5, %v1530_v44, %v1538_v2  ;;  %v1691_v50 = vadd.f32 %v1690_v46, %v1547_v28  ;;  %v1853_v15 = vpop.f32.mrb[7].mxu1 }
 0x512   : > { %vm1534_vm0 = vcmp.gt.f32.partialorder %v1461_v1, 0.0  ;;  %v1537_v20 = vmul.f32 0.01, %v1461_v1  ;;  %v1619_v27 = vpop.f32.mrb[6].mxu0 }
 0x513   : > { %v1696_v10 = vadd.f32 %v1691_v50, %v1541_v24  ;;  %v1539_v62 = vsel %vm1533_vm6, %v1459_v30, %v1536_v38  ;;  %v1620_v18 = vadd.f32 %v1619_v27, %v1547_v28  ;;  %v1621_v32 = vpop.f32.mrb[7].mxu0 }
 0x514   : > { %v1540_v9 = vsel %vm1534_vm0, %v1461_v1, %v1537_v20  ;;  %v1622_v0 = vadd.f32 %v1621_v32, %v1547_v28 }
 0x515   : > { %v1699_v37 = vmax.f32 %v1696_v10, 0.0  ;;  %v1694_v25 = vadd.f32 %v1620_v18, %v1539_v62 }
 0x516   : > { %v1695_v12 = vadd.f32 %v1622_v0, %v1540_v9 }
 0x517   : > { %v1697_v21 = vmax.f32 %v1694_v25, 0.0  ;;  %1702 = vst.msk [vmem:[%s376_s15 + $0x10] sm:$0xff] %vm558_vm2, %v1699_v37 }
 0x518   : > { %v1698_v8 = vmax.f32 %v1695_v12, 0.0 }
 0x519   : > { %1700 = vst [vmem:[%s376_s15] sm:$0xff] %v1697_v21 }
 0x51a   : > { %1701 = vst [vmem:[%s376_s15 + $0x8] sm:$0xff] %v1698_v8 }
 0x51b PF: > { %s20_s13 = sadd.s32 1, %s2449_s13  }
 0x51c   : > { %p17_p4 = scmp.ge.s32.totalorder %s20_s13, 4  }
 0x51e   :  { %19 = sbr.rel (!%p17_p4) target bundleno = 1 (0x1), region = 93 }

</bundles_post_ra>
